<compile_context>
chip_gen: v7x
topology: tpu7x:2x2x1
jax: 0.10.0
libtpu: 0.0.40
codegen_flags: <defaults>
</compile_context>

<pallas_src>
import jax
import jax.numpy as jnp
from jax import lax
from jax.experimental import pallas as pl
from jax.experimental.pallas import tpu as pltpu

MiB = 1024 * 1024


# ----------------------------------------------------------------------------- helpers
def _round_up(x, m):
    return ((x + m - 1) // m) * m


def _floor_mult(x, m):
    return max(m, (x // m) * m)


def _pick_tile(n, candidates):
    """Largest candidate dividing n, else the full extent (always BlockSpec-legal)."""
    for c in candidates:
        if n % c == 0:
            return c
    return n


def _sigmoid(x):
    # Exact identity; keeps the whole gate nonlinearity on the single EUP tanh op.
    return 0.5 * jnp.tanh(0.5 * x) + 0.5


# --------------------------------------------------------------- dense (y = x @ w + b)
def _dense_bias_kernel(x_ref, w_ref, b_ref, o_ref):
    o_ref[...] = (
        jnp.dot(x_ref[...], w_ref[...], preferred_element_type=jnp.float32)
        + b_ref[...]
    ).astype(o_ref.dtype)


def _dense(x, w, b):
    """x: (M, K), w: (K, N), b: (1, N) -> (M, N) f32. Weight-resident tiled GEMM."""
    M, K = x.shape
    _, N = w.shape
    xb, wb = x.dtype.itemsize, w.dtype.itemsize

    # Cover all of M with one tile when it fits so every (K, tn) weight tile is streamed
    # from HBM exactly once (the vocab projection is weight-bandwidth bound).
    tm = M if M * K * xb <= 4 * MiB else _pick_tile(M, (512, 256, 128, 64, 32, 16, 8))
    tn = _pick_tile(N, (2048, 1024, 512, 256, 128))

    def blk_bytes(tn_):
        return 2 * (tm * K * xb + K * tn_ * wb + tm * tn_ * 4 + tn_ * 4)

    while tn > 128 and N % (tn // 2) == 0 and blk_bytes(tn) > 24 * MiB:
        tn //= 2
    vmem_limit = int(min(max(blk_bytes(tn) + 4 * MiB, 32 * MiB), 64 * MiB))

    return pl.pallas_call(
        _dense_bias_kernel,
        out_shape=jax.ShapeDtypeStruct((M, N), jnp.float32),
        # Outer axis = N tiles: each weight tile is the resident operand on the inner axis.
        grid=(N // tn, M // tm),
        in_specs=[
            pl.BlockSpec((tm, K), lambda j, i: (i, 0)),
            pl.BlockSpec((K, tn), lambda j, i: (0, j)),
            pl.BlockSpec((1, tn), lambda j, i: (0, j)),
        ],
        out_specs=pl.BlockSpec((tm, tn), lambda j, i: (i, j)),
        compiler_params=pltpu.CompilerParams(
            dimension_semantics=("parallel", "parallel"),
            vmem_limit_bytes=vmem_limit),
    )(x, w, b)


# --------------------------------------------- fused input-projection + GRU recurrence
def _gru_kernel(x_ref, wih_ref, bih_ref, whh_ref, bhn_ref, hid_ref,
                h_scratch, gi_scratch):
    """One (t_chunk, b_chunk) time-major block.

    x_ref:      (Tt, Bb, E)  bf16 inputs (time-major)
    wih_ref:    (E, 3H)      bf16 fused [W_ir|W_iz|W_in]
    bih_ref:    (1, 3H)      f32  b_i with b_hr/b_hz folded in
    whh_ref:    (H, 3H)      bf16 fused [W_hr|W_hz|W_hn]
    bhn_ref:    (1, H)       f32  b_hn (must stay inside the r*(...) term)
    hid_ref:    (Tt, Bb, H)  bf16 output hidden states
    h_scratch:  (Bb, H)      f32  carried hidden state (persists across time chunks)
    gi_scratch: (Tt, Bb, 3H) f32  input pre-activations for this chunk
    """
    Tt, Bb, E = x_ref.shape
    H = h_scratch.shape[-1]

    # New batch chunk (time is the inner, 'arbitrary' grid axis) -> h0 = 0.
    @pl.when(pl.program_id(1) == 0)
    def _():
        h_scratch[...] = jnp.zeros_like(h_scratch)

    # (1) Input pre-activations for every timestep in the chunk: one big MXU GEMM.
    gi_scratch[...] = (
        jnp.dot(x_ref[...].reshape(Tt * Bb, E), wih_ref[...],
                preferred_element_type=jnp.float32)
        + bih_ref[...]
    ).reshape(Tt, Bb, 3 * H)

    whh = whh_ref[...]          # (H, 3H) resident for the whole chunk
    bhn = bhn_ref[...]          # (1, H)  hoisted out of the timestep loop

    # (2) Sequential recurrence: one fused (Bb, H) @ (H, 3H) matmul per timestep,
    #     dense time-major loads/stores, f32 hidden carry in vregs.
    def step(i, h):
        gi = gi_scratch[i]                                              # (Bb, 3H) f32
        gh = jnp.dot(h.astype(whh.dtype), whh,
                     preferred_element_type=jnp.float32)                # (Bb, 3H) f32
        r = _sigmoid(gi[:, :H] + gh[:, :H])
        z = _sigmoid(gi[:, H:2 * H] + gh[:, H:2 * H])
        n = jnp.tanh(gi[:, 2 * H:] + r * (gh[:, 2 * H:] + bhn))
        h_new = n + z * (h - n)                                         # == (1-z)*n + z*h
        hid_ref[i] = h_new.astype(hid_ref.dtype)
        return h_new

    h_final = lax.fori_loop(0, Tt, step, h_scratch[...],
                            unroll=True if Tt <= 8 else 2)
    h_scratch[...] = h_final


# ----------------------------------------------------------------------------- forward
def decoder_rnn_forward(features, captions, params, *, t_chunk=None, b_chunk=None):
    """features: (B, E), captions: (B, L) int32 -> logits (B, L, V) f32, batch_first."""
    emb = params["embedding"]                                          # (V, E) bf16
    wih, whh, wlin = params["wih"], params["whh"], params["wlin"]      # bf16
    bih, bhh, blin = params["bih"], params["bhh"], params["blin"]      # f32

    # TODO(synk): the embedding gather could be fused into the GRU kernel via
    # PrefetchScalarGridSpec + pl.Element row-gather; kept in the wrapper for clarity.
    cap_emb = jnp.take(emb, captions[:, :-1], axis=0)                  # (B, L-1, E)
    inputs = jnp.concatenate(
        [features.astype(emb.dtype)[:, None, :], cap_emb], axis=1)     # (B, T, E) bf16

    B, T, E = inputs.shape
    H = whh.shape[0]
    V = wlin.shape[1]

    # ---- block sizes ----------------------------------------------------------------
    if t_chunk is None:
        t_chunk = min(16, _round_up(T, 8))
    if b_chunk is None:
        b8 = _round_up(B, 8)
        b_chunk = min(256, b8)
        if b_chunk == b8 and b8 >= 16 and b8 % 16 == 0:
            b_chunk = b8 // 2      # >=2 batch chunks so v7x's second TensorCore gets work

    def gru_vmem(tc, bc):
        blk = 2 * (tc * bc * E * 2 + tc * bc * H * 2)            # x + hid, double-buffered
        wts = 2 * ((E + H) * 3 * H * 2 + 3 * H * 4 + H * 4)      # wih/whh (bf16) + biases
        scr = bc * H * 4 + tc * bc * 3 * H * 4                   # h carry + gi scratch
        return blk + wts + scr

    budget = 40 * MiB                                            # fits v7x's 64 MiB VMEM
    while gru_vmem(t_chunk, b_chunk) > budget and t_chunk > 8:
        t_chunk //= 2
    while gru_vmem(t_chunk, b_chunk) > budget and b_chunk > 8:
        b_chunk = _floor_mult(b_chunk // 2, 8)

    Tp = _round_up(T, t_chunk)
    Bp = _round_up(B, b_chunk)
    Vp = _round_up(V, 128)                                       # lane-dense vocab

    # ---- time-major, padded inputs ----------------------------------------------------
    x_tm = jnp.transpose(inputs, (1, 0, 2))                      # (T, B, E)
    x_tm = jnp.pad(x_tm, ((0, Tp - T), (0, Bp - B), (0, 0)))     # (Tp, Bp, E)

    # Fold b_hr/b_hz into the input bias (exact); b_hn must stay inside r*(...).
    bih_fold = bih.at[:, :2 * H].add(bhh[:, :2 * H])
    bhn = bhh[:, 2 * H:]

    # ---- (1)+(2) fused input projection + GRU recurrence -------------------------------
    gru_limit = int(min(max(gru_vmem(t_chunk, b_chunk) + 4 * MiB, 32 * MiB), 64 * MiB))
    hid_tm = pl.pallas_call(
        _gru_kernel,
        out_shape=jax.ShapeDtypeStruct((Tp, Bp, H), jnp.bfloat16),
        grid=(Bp // b_chunk, Tp // t_chunk),
        in_specs=[
            pl.BlockSpec((t_chunk, b_chunk, E), lambda b, t: (t, b, 0)),
            pl.BlockSpec((E, 3 * H), lambda b, t: (0, 0)),
            pl.BlockSpec((1, 3 * H), lambda b, t: (0, 0)),
            pl.BlockSpec((H, 3 * H), lambda b, t: (0, 0)),
            pl.BlockSpec((1, H), lambda b, t: (0, 0)),
        ],
        out_specs=pl.BlockSpec((t_chunk, b_chunk, H), lambda b, t: (t, b, 0)),
        scratch_shapes=[
            pltpu.VMEM((b_chunk, H), jnp.float32),
            pltpu.VMEM((t_chunk, b_chunk, 3 * H), jnp.float32),
        ],
        compiler_params=pltpu.CompilerParams(
            dimension_semantics=("parallel", "arbitrary"),   # batch-parallel, time-serial
            vmem_limit_bytes=gru_limit),
    )(x_tm, wih, bih_fold, whh, bhn)

    # ---- (3) Dropout(eval) == identity, then lane-dense vocab projection ---------------
    # TODO(synk): training-mode dropout would need pltpu.prng_seed/prng_random_bits here.
    wlin_p = jnp.pad(wlin, ((0, 0), (0, Vp - V)))
    blin_p = jnp.pad(blin, ((0, 0), (0, Vp - V)))
    logits = _dense(hid_tm.reshape(Tp * Bp, H), wlin_p, blin_p)   # (Tp*Bp, Vp) f32
    logits = logits.reshape(Tp, Bp, Vp)[:T, :B, :V]               # (T, B, V)
    return jnp.transpose(logits, (1, 0, 2))                       # (B, T, V)


# ------------------------------------------------------------------- pure-JAX reference
def decoder_rnn_reference(features, captions, params):
    emb = params["embedding"].astype(jnp.float32)
    wih = params["wih"].astype(jnp.float32)
    whh = params["whh"].astype(jnp.float32)
    wlin = params["wlin"].astype(jnp.float32)
    bih, bhh, blin = params["bih"], params["bhh"], params["blin"]

    cap_emb = jnp.take(emb, captions[:, :-1], axis=0)
    inputs = jnp.concatenate(
        [features.astype(jnp.float32)[:, None, :], cap_emb], axis=1)   # (B, T, E)
    x_tm = jnp.transpose(inputs, (1, 0, 2))                            # (T, B, E)
    B = inputs.shape[0]
    H = whh.shape[0]

    def step(h, x):
        gi = x @ wih + bih
        gh = h @ whh + bhh
        r = jax.nn.sigmoid(gi[:, :H] + gh[:, :H])
        z = jax.nn.sigmoid(gi[:, H:2 * H] + gh[:, H:2 * H])
        n = jnp.tanh(gi[:, 2 * H:] + r * gh[:, 2 * H:])
        h_new = (1.0 - z) * n + z * h
        return h_new, h_new

    _, hid_tm = jax.lax.scan(step, jnp.zeros((B, H), jnp.float32), x_tm)
    logits_tm = hid_tm @ wlin + blin
    return jnp.transpose(logits_tm, (1, 0, 2))                         # (B, T, V)


# ---------------------------------------------------------------------------------- params
def init_params(key, embed_size, hidden_size, vocab_size):
    ks = jax.random.split(key, 7)
    s = 0.1
    f32 = lambda k, shp: (s * jax.random.normal(k, shp)).astype(jnp.float32)
    bf16 = lambda k, shp: f32(k, shp).astype(jnp.bfloat16)
    # GRU weights stored fused & pre-transposed for right-multiplication, gate order (r,z,n):
    #   wih = [W_ir^T | W_iz^T | W_in^T] (E, 3H),  whh = [W_hr^T | W_hz^T | W_hn^T] (H, 3H)
    # Weights in bf16 (halves HBM traffic, native MXU dtype); biases stay f32.
    return {
        "embedding": bf16(ks[0], (vocab_size, embed_size)),
        "wih": bf16(ks[1], (embed_size, 3 * hidden_size)),
        "bih": f32(ks[2], (1, 3 * hidden_size)),
        "whh": bf16(ks[3], (hidden_size, 3 * hidden_size)),
        "bhh": f32(ks[4], (1, 3 * hidden_size)),
        "wlin": bf16(ks[5], (hidden_size, vocab_size)),
        "blin": f32(ks[6], (1, vocab_size)),
    }


if __name__ == "__main__":
    embed_size, hidden_size, vocab_size = 32, 32, 64
    B, caption_len = 2, 8          # sequence length T = caption_len (1 feature + 7 tokens)

    key = jax.random.PRNGKey(0)
    k_feat, k_cap, k_param = jax.random.split(key, 3)

    features = jax.random.normal(k_feat, (B, embed_size), dtype=jnp.float32)
    captions = jax.random.randint(k_cap, (B, caption_len), 0, vocab_size, dtype=jnp.int32)
    params = init_params(k_param, embed_size, hidden_size, vocab_size)

    out = decoder_rnn_forward(features, captions, params)
    out = jax.block_until_ready(out)

    ref = decoder_rnn_reference(features, captions, params)
    assert out.shape == (B, caption_len, vocab_size)
    # bf16 weights / activation streams inside the kernels vs. f32 reference -> relaxed tol.
    assert jnp.allclose(out, ref, atol=2e-2, rtol=2e-2), "Pallas kernel mismatch vs JAX reference"

    print("KERNEL_OK")
</pallas_src>

<mosaic_0001>
module attributes {stable_mosaic.version = 11 : i64} {
  func.func @_gru_kernel(%arg0: i32, %arg1: i32, %arg2: memref<8x8x32xbf16, #tpu.memory_space<vmem>>, %arg3: memref<32x96xbf16, #tpu.memory_space<vmem>>, %arg4: memref<1x96xf32, #tpu.memory_space<vmem>>, %arg5: memref<32x96xbf16, #tpu.memory_space<vmem>>, %arg6: memref<1x32xf32, #tpu.memory_space<vmem>>, %arg7: memref<8x8x32xbf16, #tpu.memory_space<vmem>>, %arg8: memref<8x32xf32, #tpu.memory_space<vmem>>, %arg9: memref<8x8x96xf32, #tpu.memory_space<vmem>>) attributes {dimension_semantics = [#tpu.dimension_semantics<parallel>, #tpu.dimension_semantics<arbitrary>], iteration_bounds = array<i64: 1, 1>, scalar_prefetch = 0 : i64, scratch_operands = 2 : i64, tpu.core_type = #tpu.core_type<tc>, window_params = [{transform_indices = @transform_0, window_bounds = array<i64: 8, 8, 32>}, {pipeline_mode = #tpu.pipeline_mode<synchronous>, transform_indices = @transform_1, window_bounds = array<i64: 32, 96>}, {pipeline_mode = #tpu.pipeline_mode<synchronous>, transform_indices = @transform_2, window_bounds = array<i64: 1, 96>}, {pipeline_mode = #tpu.pipeline_mode<synchronous>, transform_indices = @transform_3, window_bounds = array<i64: 32, 96>}, {pipeline_mode = #tpu.pipeline_mode<synchronous>, transform_indices = @transform_4, window_bounds = array<i64: 1, 32>}, {transform_indices = @transform_5, window_bounds = array<i64: 8, 8, 32>}]} {
    %c0_i32 = arith.constant 0 : i32
    %0 = arith.cmpi eq, %arg1, %c0_i32 : i32
    %1 = arith.extui %0 : i1 to i32
    %c0_i32_0 = arith.constant 0 : i32
    %2 = arith.cmpi ne, %1, %c0_i32_0 : i32
    scf.if %2 {
      %cst_107 = arith.constant 0.000000e+00 : f32
      %336 = vector.broadcast %cst_107 : f32 to vector<8x32xf32>
      %c0_108 = arith.constant 0 : index
      %c0_109 = arith.constant 0 : index
      %337 = vector.load %arg8[%c0_108, %c0_109] : memref<8x32xf32, #tpu.memory_space<vmem>>, vector<8x32xf32>
      tpu.vector_store %arg8[%c0_108, %c0_109], %336 {strides = array<i32>} : memref<8x32xf32, #tpu.memory_space<vmem>>, vector<8x32xf32>,
    } else {
    }
    %c0 = arith.constant 0 : index
    %c0_1 = arith.constant 0 : index
    %c0_2 = arith.constant 0 : index
    %3 = vector.load %arg2[%c0, %c0_1, %c0_2] : memref<8x8x32xbf16, #tpu.memory_space<vmem>>, vector<8x8x32xbf16>
    %4 = vector.shape_cast %3 : vector<8x8x32xbf16> to vector<64x32xbf16>
    %c0_3 = arith.constant 0 : index
    %c0_4 = arith.constant 0 : index
    %5 = vector.load %arg3[%c0_3, %c0_4] : memref<32x96xbf16, #tpu.memory_space<vmem>>, vector<32x96xbf16>
    %cst = arith.constant dense<0.000000e+00> : vector<64x96xf32>
    %6 = tpu.matmul %4, %5, %cst {dimension_numbers = #tpu.dot_dimension_numbers<[1], [0], [0], [1], [0, 0, 1, 1], [], []>} : vector<64x32xbf16>, vector<32x96xbf16>, vector<64x96xf32> -> vector<64x96xf32>
    %c0_5 = arith.constant 0 : index
    %c0_6 = arith.constant 0 : index
    %7 = vector.load %arg4[%c0_5, %c0_6] : memref<1x96xf32, #tpu.memory_space<vmem>>, vector<1x96xf32>
    %8 = vector.broadcast %7 : vector<1x96xf32> to vector<64x96xf32>
    %9 = arith.addf %6, %8 : vector<64x96xf32>
    %10 = vector.shape_cast %9 : vector<64x96xf32> to vector<8x8x96xf32>
    %c0_7 = arith.constant 0 : index
    %c0_8 = arith.constant 0 : index
    %c0_9 = arith.constant 0 : index
    %11 = vector.load %arg9[%c0_7, %c0_8, %c0_9] : memref<8x8x96xf32, #tpu.memory_space<vmem>>, vector<8x8x96xf32>
    tpu.vector_store %arg9[%c0_7, %c0_8, %c0_9], %10 {strides = array<i32>} : memref<8x8x96xf32, #tpu.memory_space<vmem>>, vector<8x8x96xf32>,
    %c0_10 = arith.constant 0 : index
    %c0_11 = arith.constant 0 : index
    %12 = vector.load %arg5[%c0_10, %c0_11] : memref<32x96xbf16, #tpu.memory_space<vmem>>, vector<32x96xbf16>
    %c0_12 = arith.constant 0 : index
    %c0_13 = arith.constant 0 : index
    %13 = vector.load %arg6[%c0_12, %c0_13] : memref<1x32xf32, #tpu.memory_space<vmem>>, vector<1x32xf32>
    %c0_14 = arith.constant 0 : index
    %c0_15 = arith.constant 0 : index
    %14 = vector.load %arg8[%c0_14, %c0_15] : memref<8x32xf32, #tpu.memory_space<vmem>>, vector<8x32xf32>
    %c0_i32_16 = arith.constant 0 : i32
    %15 = arith.index_cast %c0_i32_16 : i32 to index
    %c0_17 = arith.constant 0 : index
    %c0_18 = arith.constant 0 : index
    %16 = vector.load %arg9[%15, %c0_17, %c0_18] : memref<8x8x96xf32, #tpu.memory_space<vmem>>, vector<1x8x96xf32>
    %17 = vector.shape_cast %16 : vector<1x8x96xf32> to vector<8x96xf32>
    %18 = arith.truncf %14 : vector<8x32xf32> to vector<8x32xbf16>
    %cst_19 = arith.constant dense<0.000000e+00> : vector<8x96xf32>
    %19 = tpu.matmul %18, %12, %cst_19 {dimension_numbers = #tpu.dot_dimension_numbers<[1], [0], [0], [1], [0, 0, 1, 1], [], []>} : vector<8x32xbf16>, vector<32x96xbf16>, vector<8x96xf32> -> vector<8x96xf32>
    %20 = vector.extract_strided_slice %17 {offsets = [0, 0], sizes = [8, 32], strides = [1, 1]} : vector<8x96xf32> to vector<8x32xf32>
    %21 = vector.extract_strided_slice %19 {offsets = [0, 0], sizes = [8, 32], strides = [1, 1]} : vector<8x96xf32> to vector<8x32xf32>
    %22 = arith.addf %20, %21 : vector<8x32xf32>
    %cst_20 = arith.constant 5.000000e-01 : f32
    %23 = vector.broadcast %cst_20 : f32 to vector<8x32xf32>
    %24 = arith.mulf %23, %22 : vector<8x32xf32>
    %25 = math.tanh %24 : vector<8x32xf32>
    %cst_21 = arith.constant 5.000000e-01 : f32
    %26 = vector.broadcast %cst_21 : f32 to vector<8x32xf32>
    %27 = arith.mulf %26, %25 : vector<8x32xf32>
    %cst_22 = arith.constant 5.000000e-01 : f32
    %28 = vector.broadcast %cst_22 : f32 to vector<8x32xf32>
    %29 = arith.addf %27, %28 : vector<8x32xf32>
    %30 = vector.extract_strided_slice %17 {offsets = [0, 32], sizes = [8, 32], strides = [1, 1]} : vector<8x96xf32> to vector<8x32xf32>
    %31 = vector.extract_strided_slice %19 {offsets = [0, 32], sizes = [8, 32], strides = [1, 1]} : vector<8x96xf32> to vector<8x32xf32>
    %32 = arith.addf %30, %31 : vector<8x32xf32>
    %cst_23 = arith.constant 5.000000e-01 : f32
    %33 = vector.broadcast %cst_23 : f32 to vector<8x32xf32>
    %34 = arith.mulf %33, %32 : vector<8x32xf32>
    %35 = math.tanh %34 : vector<8x32xf32>
    %cst_24 = arith.constant 5.000000e-01 : f32
    %36 = vector.broadcast %cst_24 : f32 to vector<8x32xf32>
    %37 = arith.mulf %36, %35 : vector<8x32xf32>
    %cst_25 = arith.constant 5.000000e-01 : f32
    %38 = vector.broadcast %cst_25 : f32 to vector<8x32xf32>
    %39 = arith.addf %37, %38 : vector<8x32xf32>
    %40 = vector.extract_strided_slice %17 {offsets = [0, 64], sizes = [8, 32], strides = [1, 1]} : vector<8x96xf32> to vector<8x32xf32>
    %41 = vector.extract_strided_slice %19 {offsets = [0, 64], sizes = [8, 32], strides = [1, 1]} : vector<8x96xf32> to vector<8x32xf32>
    %42 = vector.broadcast %13 : vector<1x32xf32> to vector<8x32xf32>
    %43 = arith.addf %41, %42 : vector<8x32xf32>
    %44 = arith.mulf %29, %43 : vector<8x32xf32>
    %45 = arith.addf %40, %44 : vector<8x32xf32>
    %46 = math.tanh %45 : vector<8x32xf32>
    %47 = arith.subf %14, %46 : vector<8x32xf32>
    %48 = arith.mulf %39, %47 : vector<8x32xf32>
    %49 = arith.addf %46, %48 : vector<8x32xf32>
    %50 = arith.truncf %49 : vector<8x32xf32> to vector<8x32xbf16>
    %51 = arith.index_cast %c0_i32_16 : i32 to index
    %c0_26 = arith.constant 0 : index
    %c0_27 = arith.constant 0 : index
    %52 = vector.load %arg7[%51, %c0_26, %c0_27] : memref<8x8x32xbf16, #tpu.memory_space<vmem>>, vector<1x8x32xbf16>
    %53 = vector.shape_cast %52 : vector<1x8x32xbf16> to vector<8x32xbf16>
    %54 = vector.shape_cast %50 : vector<8x32xbf16> to vector<1x8x32xbf16>
    tpu.vector_store %arg7[%51, %c0_26, %c0_27], %54 {strides = array<i32>} : memref<8x8x32xbf16, #tpu.memory_space<vmem>>, vector<1x8x32xbf16>,
    %c1_i32 = arith.constant 1 : i32
    %55 = arith.index_cast %c1_i32 : i32 to index
    %c0_28 = arith.constant 0 : index
    %c0_29 = arith.constant 0 : index
    %56 = vector.load %arg9[%55, %c0_28, %c0_29] : memref<8x8x96xf32, #tpu.memory_space<vmem>>, vector<1x8x96xf32>
    %57 = vector.shape_cast %56 : vector<1x8x96xf32> to vector<8x96xf32>
    %58 = arith.truncf %49 : vector<8x32xf32> to vector<8x32xbf16>
    %cst_30 = arith.constant dense<0.000000e+00> : vector<8x96xf32>
    %59 = tpu.matmul %58, %12, %cst_30 {dimension_numbers = #tpu.dot_dimension_numbers<[1], [0], [0], [1], [0, 0, 1, 1], [], []>} : vector<8x32xbf16>, vector<32x96xbf16>, vector<8x96xf32> -> vector<8x96xf32>
    %60 = vector.extract_strided_slice %57 {offsets = [0, 0], sizes = [8, 32], strides = [1, 1]} : vector<8x96xf32> to vector<8x32xf32>
    %61 = vector.extract_strided_slice %59 {offsets = [0, 0], sizes = [8, 32], strides = [1, 1]} : vector<8x96xf32> to vector<8x32xf32>
    %62 = arith.addf %60, %61 : vector<8x32xf32>
    %cst_31 = arith.constant 5.000000e-01 : f32
    %63 = vector.broadcast %cst_31 : f32 to vector<8x32xf32>
    %64 = arith.mulf %63, %62 : vector<8x32xf32>
    %65 = math.tanh %64 : vector<8x32xf32>
    %cst_32 = arith.constant 5.000000e-01 : f32
    %66 = vector.broadcast %cst_32 : f32 to vector<8x32xf32>
    %67 = arith.mulf %66, %65 : vector<8x32xf32>
    %cst_33 = arith.constant 5.000000e-01 : f32
    %68 = vector.broadcast %cst_33 : f32 to vector<8x32xf32>
    %69 = arith.addf %67, %68 : vector<8x32xf32>
    %70 = vector.extract_strided_slice %57 {offsets = [0, 32], sizes = [8, 32], strides = [1, 1]} : vector<8x96xf32> to vector<8x32xf32>
    %71 = vector.extract_strided_slice %59 {offsets = [0, 32], sizes = [8, 32], strides = [1, 1]} : vector<8x96xf32> to vector<8x32xf32>
    %72 = arith.addf %70, %71 : vector<8x32xf32>
    %cst_34 = arith.constant 5.000000e-01 : f32
    %73 = vector.broadcast %cst_34 : f32 to vector<8x32xf32>
    %74 = arith.mulf %73, %72 : vector<8x32xf32>
    %75 = math.tanh %74 : vector<8x32xf32>
    %cst_35 = arith.constant 5.000000e-01 : f32
    %76 = vector.broadcast %cst_35 : f32 to vector<8x32xf32>
    %77 = arith.mulf %76, %75 : vector<8x32xf32>
    %cst_36 = arith.constant 5.000000e-01 : f32
    %78 = vector.broadcast %cst_36 : f32 to vector<8x32xf32>
    %79 = arith.addf %77, %78 : vector<8x32xf32>
    %80 = vector.extract_strided_slice %57 {offsets = [0, 64], sizes = [8, 32], strides = [1, 1]} : vector<8x96xf32> to vector<8x32xf32>
    %81 = vector.extract_strided_slice %59 {offsets = [0, 64], sizes = [8, 32], strides = [1, 1]} : vector<8x96xf32> to vector<8x32xf32>
    %82 = vector.broadcast %13 : vector<1x32xf32> to vector<8x32xf32>
    %83 = arith.addf %81, %82 : vector<8x32xf32>
    %84 = arith.mulf %69, %83 : vector<8x32xf32>
    %85 = arith.addf %80, %84 : vector<8x32xf32>
    %86 = math.tanh %85 : vector<8x32xf32>
    %87 = arith.subf %49, %86 : vector<8x32xf32>
    %88 = arith.mulf %79, %87 : vector<8x32xf32>
    %89 = arith.addf %86, %88 : vector<8x32xf32>
    %90 = arith.truncf %89 : vector<8x32xf32> to vector<8x32xbf16>
    %91 = arith.index_cast %c1_i32 : i32 to index
    %c0_37 = arith.constant 0 : index
    %c0_38 = arith.constant 0 : index
    %92 = vector.load %arg7[%91, %c0_37, %c0_38] : memref<8x8x32xbf16, #tpu.memory_space<vmem>>, vector<1x8x32xbf16>
    %93 = vector.shape_cast %92 : vector<1x8x32xbf16> to vector<8x32xbf16>
    %94 = vector.shape_cast %90 : vector<8x32xbf16> to vector<1x8x32xbf16>
    tpu.vector_store %arg7[%91, %c0_37, %c0_38], %94 {strides = array<i32>} : memref<8x8x32xbf16, #tpu.memory_space<vmem>>, vector<1x8x32xbf16>,
    %c2_i32 = arith.constant 2 : i32
    %95 = arith.index_cast %c2_i32 : i32 to index
    %c0_39 = arith.constant 0 : index
    %c0_40 = arith.constant 0 : index
    %96 = vector.load %arg9[%95, %c0_39, %c0_40] : memref<8x8x96xf32, #tpu.memory_space<vmem>>, vector<1x8x96xf32>
    %97 = vector.shape_cast %96 : vector<1x8x96xf32> to vector<8x96xf32>
    %98 = arith.truncf %89 : vector<8x32xf32> to vector<8x32xbf16>
    %cst_41 = arith.constant dense<0.000000e+00> : vector<8x96xf32>
    %99 = tpu.matmul %98, %12, %cst_41 {dimension_numbers = #tpu.dot_dimension_numbers<[1], [0], [0], [1], [0, 0, 1, 1], [], []>} : vector<8x32xbf16>, vector<32x96xbf16>, vector<8x96xf32> -> vector<8x96xf32>
    %100 = vector.extract_strided_slice %97 {offsets = [0, 0], sizes = [8, 32], strides = [1, 1]} : vector<8x96xf32> to vector<8x32xf32>
    %101 = vector.extract_strided_slice %99 {offsets = [0, 0], sizes = [8, 32], strides = [1, 1]} : vector<8x96xf32> to vector<8x32xf32>
    %102 = arith.addf %100, %101 : vector<8x32xf32>
    %cst_42 = arith.constant 5.000000e-01 : f32
    %103 = vector.broadcast %cst_42 : f32 to vector<8x32xf32>
    %104 = arith.mulf %103, %102 : vector<8x32xf32>
    %105 = math.tanh %104 : vector<8x32xf32>
    %cst_43 = arith.constant 5.000000e-01 : f32
    %106 = vector.broadcast %cst_43 : f32 to vector<8x32xf32>
    %107 = arith.mulf %106, %105 : vector<8x32xf32>
    %cst_44 = arith.constant 5.000000e-01 : f32
    %108 = vector.broadcast %cst_44 : f32 to vector<8x32xf32>
    %109 = arith.addf %107, %108 : vector<8x32xf32>
    %110 = vector.extract_strided_slice %97 {offsets = [0, 32], sizes = [8, 32], strides = [1, 1]} : vector<8x96xf32> to vector<8x32xf32>
    %111 = vector.extract_strided_slice %99 {offsets = [0, 32], sizes = [8, 32], strides = [1, 1]} : vector<8x96xf32> to vector<8x32xf32>
    %112 = arith.addf %110, %111 : vector<8x32xf32>
    %cst_45 = arith.constant 5.000000e-01 : f32
    %113 = vector.broadcast %cst_45 : f32 to vector<8x32xf32>
    %114 = arith.mulf %113, %112 : vector<8x32xf32>
    %115 = math.tanh %114 : vector<8x32xf32>
    %cst_46 = arith.constant 5.000000e-01 : f32
    %116 = vector.broadcast %cst_46 : f32 to vector<8x32xf32>
    %117 = arith.mulf %116, %115 : vector<8x32xf32>
    %cst_47 = arith.constant 5.000000e-01 : f32
    %118 = vector.broadcast %cst_47 : f32 to vector<8x32xf32>
    %119 = arith.addf %117, %118 : vector<8x32xf32>
    %120 = vector.extract_strided_slice %97 {offsets = [0, 64], sizes = [8, 32], strides = [1, 1]} : vector<8x96xf32> to vector<8x32xf32>
    %121 = vector.extract_strided_slice %99 {offsets = [0, 64], sizes = [8, 32], strides = [1, 1]} : vector<8x96xf32> to vector<8x32xf32>
    %122 = vector.broadcast %13 : vector<1x32xf32> to vector<8x32xf32>
    %123 = arith.addf %121, %122 : vector<8x32xf32>
    %124 = arith.mulf %109, %123 : vector<8x32xf32>
    %125 = arith.addf %120, %124 : vector<8x32xf32>
    %126 = math.tanh %125 : vector<8x32xf32>
    %127 = arith.subf %89, %126 : vector<8x32xf32>
    %128 = arith.mulf %119, %127 : vector<8x32xf32>
    %129 = arith.addf %126, %128 : vector<8x32xf32>
    %130 = arith.truncf %129 : vector<8x32xf32> to vector<8x32xbf16>
    %131 = arith.index_cast %c2_i32 : i32 to index
    %c0_48 = arith.constant 0 : index
    %c0_49 = arith.constant 0 : index
    %132 = vector.load %arg7[%131, %c0_48, %c0_49] : memref<8x8x32xbf16, #tpu.memory_space<vmem>>, vector<1x8x32xbf16>
    %133 = vector.shape_cast %132 : vector<1x8x32xbf16> to vector<8x32xbf16>
    %134 = vector.shape_cast %130 : vector<8x32xbf16> to vector<1x8x32xbf16>
    tpu.vector_store %arg7[%131, %c0_48, %c0_49], %134 {strides = array<i32>} : memref<8x8x32xbf16, #tpu.memory_space<vmem>>, vector<1x8x32xbf16>,
    %c3_i32 = arith.constant 3 : i32
    %135 = arith.index_cast %c3_i32 : i32 to index
    %c0_50 = arith.constant 0 : index
    %c0_51 = arith.constant 0 : index
    %136 = vector.load %arg9[%135, %c0_50, %c0_51] : memref<8x8x96xf32, #tpu.memory_space<vmem>>, vector<1x8x96xf32>
    %137 = vector.shape_cast %136 : vector<1x8x96xf32> to vector<8x96xf32>
    %138 = arith.truncf %129 : vector<8x32xf32> to vector<8x32xbf16>
    %cst_52 = arith.constant dense<0.000000e+00> : vector<8x96xf32>
    %139 = tpu.matmul %138, %12, %cst_52 {dimension_numbers = #tpu.dot_dimension_numbers<[1], [0], [0], [1], [0, 0, 1, 1], [], []>} : vector<8x32xbf16>, vector<32x96xbf16>, vector<8x96xf32> -> vector<8x96xf32>
    %140 = vector.extract_strided_slice %137 {offsets = [0, 0], sizes = [8, 32], strides = [1, 1]} : vector<8x96xf32> to vector<8x32xf32>
    %141 = vector.extract_strided_slice %139 {offsets = [0, 0], sizes = [8, 32], strides = [1, 1]} : vector<8x96xf32> to vector<8x32xf32>
    %142 = arith.addf %140, %141 : vector<8x32xf32>
    %cst_53 = arith.constant 5.000000e-01 : f32
    %143 = vector.broadcast %cst_53 : f32 to vector<8x32xf32>
    %144 = arith.mulf %143, %142 : vector<8x32xf32>
    %145 = math.tanh %144 : vector<8x32xf32>
    %cst_54 = arith.constant 5.000000e-01 : f32
    %146 = vector.broadcast %cst_54 : f32 to vector<8x32xf32>
    %147 = arith.mulf %146, %145 : vector<8x32xf32>
    %cst_55 = arith.constant 5.000000e-01 : f32
    %148 = vector.broadcast %cst_55 : f32 to vector<8x32xf32>
    %149 = arith.addf %147, %148 : vector<8x32xf32>
    %150 = vector.extract_strided_slice %137 {offsets = [0, 32], sizes = [8, 32], strides = [1, 1]} : vector<8x96xf32> to vector<8x32xf32>
    %151 = vector.extract_strided_slice %139 {offsets = [0, 32], sizes = [8, 32], strides = [1, 1]} : vector<8x96xf32> to vector<8x32xf32>
    %152 = arith.addf %150, %151 : vector<8x32xf32>
    %cst_56 = arith.constant 5.000000e-01 : f32
    %153 = vector.broadcast %cst_56 : f32 to vector<8x32xf32>
    %154 = arith.mulf %153, %152 : vector<8x32xf32>
    %155 = math.tanh %154 : vector<8x32xf32>
    %cst_57 = arith.constant 5.000000e-01 : f32
    %156 = vector.broadcast %cst_57 : f32 to vector<8x32xf32>
    %157 = arith.mulf %156, %155 : vector<8x32xf32>
    %cst_58 = arith.constant 5.000000e-01 : f32
    %158 = vector.broadcast %cst_58 : f32 to vector<8x32xf32>
    %159 = arith.addf %157, %158 : vector<8x32xf32>
    %160 = vector.extract_strided_slice %137 {offsets = [0, 64], sizes = [8, 32], strides = [1, 1]} : vector<8x96xf32> to vector<8x32xf32>
    %161 = vector.extract_strided_slice %139 {offsets = [0, 64], sizes = [8, 32], strides = [1, 1]} : vector<8x96xf32> to vector<8x32xf32>
    %162 = vector.broadcast %13 : vector<1x32xf32> to vector<8x32xf32>
    %163 = arith.addf %161, %162 : vector<8x32xf32>
    %164 = arith.mulf %149, %163 : vector<8x32xf32>
    %165 = arith.addf %160, %164 : vector<8x32xf32>
    %166 = math.tanh %165 : vector<8x32xf32>
    %167 = arith.subf %129, %166 : vector<8x32xf32>
    %168 = arith.mulf %159, %167 : vector<8x32xf32>
    %169 = arith.addf %166, %168 : vector<8x32xf32>
    %170 = arith.truncf %169 : vector<8x32xf32> to vector<8x32xbf16>
    %171 = arith.index_cast %c3_i32 : i32 to index
    %c0_59 = arith.constant 0 : index
    %c0_60 = arith.constant 0 : index
    %172 = vector.load %arg7[%171, %c0_59, %c0_60] : memref<8x8x32xbf16, #tpu.memory_space<vmem>>, vector<1x8x32xbf16>
    %173 = vector.shape_cast %172 : vector<1x8x32xbf16> to vector<8x32xbf16>
    %174 = vector.shape_cast %170 : vector<8x32xbf16> to vector<1x8x32xbf16>
    tpu.vector_store %arg7[%171, %c0_59, %c0_60], %174 {strides = array<i32>} : memref<8x8x32xbf16, #tpu.memory_space<vmem>>, vector<1x8x32xbf16>,
    %c4_i32 = arith.constant 4 : i32
    %175 = arith.index_cast %c4_i32 : i32 to index
    %c0_61 = arith.constant 0 : index
    %c0_62 = arith.constant 0 : index
    %176 = vector.load %arg9[%175, %c0_61, %c0_62] : memref<8x8x96xf32, #tpu.memory_space<vmem>>, vector<1x8x96xf32>
    %177 = vector.shape_cast %176 : vector<1x8x96xf32> to vector<8x96xf32>
    %178 = arith.truncf %169 : vector<8x32xf32> to vector<8x32xbf16>
    %cst_63 = arith.constant dense<0.000000e+00> : vector<8x96xf32>
    %179 = tpu.matmul %178, %12, %cst_63 {dimension_numbers = #tpu.dot_dimension_numbers<[1], [0], [0], [1], [0, 0, 1, 1], [], []>} : vector<8x32xbf16>, vector<32x96xbf16>, vector<8x96xf32> -> vector<8x96xf32>
    %180 = vector.extract_strided_slice %177 {offsets = [0, 0], sizes = [8, 32], strides = [1, 1]} : vector<8x96xf32> to vector<8x32xf32>
    %181 = vector.extract_strided_slice %179 {offsets = [0, 0], sizes = [8, 32], strides = [1, 1]} : vector<8x96xf32> to vector<8x32xf32>
    %182 = arith.addf %180, %181 : vector<8x32xf32>
    %cst_64 = arith.constant 5.000000e-01 : f32
    %183 = vector.broadcast %cst_64 : f32 to vector<8x32xf32>
    %184 = arith.mulf %183, %182 : vector<8x32xf32>
    %185 = math.tanh %184 : vector<8x32xf32>
    %cst_65 = arith.constant 5.000000e-01 : f32
    %186 = vector.broadcast %cst_65 : f32 to vector<8x32xf32>
    %187 = arith.mulf %186, %185 : vector<8x32xf32>
    %cst_66 = arith.constant 5.000000e-01 : f32
    %188 = vector.broadcast %cst_66 : f32 to vector<8x32xf32>
    %189 = arith.addf %187, %188 : vector<8x32xf32>
    %190 = vector.extract_strided_slice %177 {offsets = [0, 32], sizes = [8, 32], strides = [1, 1]} : vector<8x96xf32> to vector<8x32xf32>
    %191 = vector.extract_strided_slice %179 {offsets = [0, 32], sizes = [8, 32], strides = [1, 1]} : vector<8x96xf32> to vector<8x32xf32>
    %192 = arith.addf %190, %191 : vector<8x32xf32>
    %cst_67 = arith.constant 5.000000e-01 : f32
    %193 = vector.broadcast %cst_67 : f32 to vector<8x32xf32>
    %194 = arith.mulf %193, %192 : vector<8x32xf32>
    %195 = math.tanh %194 : vector<8x32xf32>
    %cst_68 = arith.constant 5.000000e-01 : f32
    %196 = vector.broadcast %cst_68 : f32 to vector<8x32xf32>
    %197 = arith.mulf %196, %195 : vector<8x32xf32>
    %cst_69 = arith.constant 5.000000e-01 : f32
    %198 = vector.broadcast %cst_69 : f32 to vector<8x32xf32>
    %199 = arith.addf %197, %198 : vector<8x32xf32>
    %200 = vector.extract_strided_slice %177 {offsets = [0, 64], sizes = [8, 32], strides = [1, 1]} : vector<8x96xf32> to vector<8x32xf32>
    %201 = vector.extract_strided_slice %179 {offsets = [0, 64], sizes = [8, 32], strides = [1, 1]} : vector<8x96xf32> to vector<8x32xf32>
    %202 = vector.broadcast %13 : vector<1x32xf32> to vector<8x32xf32>
    %203 = arith.addf %201, %202 : vector<8x32xf32>
    %204 = arith.mulf %189, %203 : vector<8x32xf32>
    %205 = arith.addf %200, %204 : vector<8x32xf32>
    %206 = math.tanh %205 : vector<8x32xf32>
    %207 = arith.subf %169, %206 : vector<8x32xf32>
    %208 = arith.mulf %199, %207 : vector<8x32xf32>
    %209 = arith.addf %206, %208 : vector<8x32xf32>
    %210 = arith.truncf %209 : vector<8x32xf32> to vector<8x32xbf16>
    %211 = arith.index_cast %c4_i32 : i32 to index
    %c0_70 = arith.constant 0 : index
    %c0_71 = arith.constant 0 : index
    %212 = vector.load %arg7[%211, %c0_70, %c0_71] : memref<8x8x32xbf16, #tpu.memory_space<vmem>>, vector<1x8x32xbf16>
    %213 = vector.shape_cast %212 : vector<1x8x32xbf16> to vector<8x32xbf16>
    %214 = vector.shape_cast %210 : vector<8x32xbf16> to vector<1x8x32xbf16>
    tpu.vector_store %arg7[%211, %c0_70, %c0_71], %214 {strides = array<i32>} : memref<8x8x32xbf16, #tpu.memory_space<vmem>>, vector<1x8x32xbf16>,
    %c5_i32 = arith.constant 5 : i32
    %215 = arith.index_cast %c5_i32 : i32 to index
    %c0_72 = arith.constant 0 : index
    %c0_73 = arith.constant 0 : index
    %216 = vector.load %arg9[%215, %c0_72, %c0_73] : memref<8x8x96xf32, #tpu.memory_space<vmem>>, vector<1x8x96xf32>
    %217 = vector.shape_cast %216 : vector<1x8x96xf32> to vector<8x96xf32>
    %218 = arith.truncf %209 : vector<8x32xf32> to vector<8x32xbf16>
    %cst_74 = arith.constant dense<0.000000e+00> : vector<8x96xf32>
    %219 = tpu.matmul %218, %12, %cst_74 {dimension_numbers = #tpu.dot_dimension_numbers<[1], [0], [0], [1], [0, 0, 1, 1], [], []>} : vector<8x32xbf16>, vector<32x96xbf16>, vector<8x96xf32> -> vector<8x96xf32>
    %220 = vector.extract_strided_slice %217 {offsets = [0, 0], sizes = [8, 32], strides = [1, 1]} : vector<8x96xf32> to vector<8x32xf32>
    %221 = vector.extract_strided_slice %219 {offsets = [0, 0], sizes = [8, 32], strides = [1, 1]} : vector<8x96xf32> to vector<8x32xf32>
    %222 = arith.addf %220, %221 : vector<8x32xf32>
    %cst_75 = arith.constant 5.000000e-01 : f32
    %223 = vector.broadcast %cst_75 : f32 to vector<8x32xf32>
    %224 = arith.mulf %223, %222 : vector<8x32xf32>
    %225 = math.tanh %224 : vector<8x32xf32>
    %cst_76 = arith.constant 5.000000e-01 : f32
    %226 = vector.broadcast %cst_76 : f32 to vector<8x32xf32>
    %227 = arith.mulf %226, %225 : vector<8x32xf32>
    %cst_77 = arith.constant 5.000000e-01 : f32
    %228 = vector.broadcast %cst_77 : f32 to vector<8x32xf32>
    %229 = arith.addf %227, %228 : vector<8x32xf32>
    %230 = vector.extract_strided_slice %217 {offsets = [0, 32], sizes = [8, 32], strides = [1, 1]} : vector<8x96xf32> to vector<8x32xf32>
    %231 = vector.extract_strided_slice %219 {offsets = [0, 32], sizes = [8, 32], strides = [1, 1]} : vector<8x96xf32> to vector<8x32xf32>
    %232 = arith.addf %230, %231 : vector<8x32xf32>
    %cst_78 = arith.constant 5.000000e-01 : f32
    %233 = vector.broadcast %cst_78 : f32 to vector<8x32xf32>
    %234 = arith.mulf %233, %232 : vector<8x32xf32>
    %235 = math.tanh %234 : vector<8x32xf32>
    %cst_79 = arith.constant 5.000000e-01 : f32
    %236 = vector.broadcast %cst_79 : f32 to vector<8x32xf32>
    %237 = arith.mulf %236, %235 : vector<8x32xf32>
    %cst_80 = arith.constant 5.000000e-01 : f32
    %238 = vector.broadcast %cst_80 : f32 to vector<8x32xf32>
    %239 = arith.addf %237, %238 : vector<8x32xf32>
    %240 = vector.extract_strided_slice %217 {offsets = [0, 64], sizes = [8, 32], strides = [1, 1]} : vector<8x96xf32> to vector<8x32xf32>
    %241 = vector.extract_strided_slice %219 {offsets = [0, 64], sizes = [8, 32], strides = [1, 1]} : vector<8x96xf32> to vector<8x32xf32>
    %242 = vector.broadcast %13 : vector<1x32xf32> to vector<8x32xf32>
    %243 = arith.addf %241, %242 : vector<8x32xf32>
    %244 = arith.mulf %229, %243 : vector<8x32xf32>
    %245 = arith.addf %240, %244 : vector<8x32xf32>
    %246 = math.tanh %245 : vector<8x32xf32>
    %247 = arith.subf %209, %246 : vector<8x32xf32>
    %248 = arith.mulf %239, %247 : vector<8x32xf32>
    %249 = arith.addf %246, %248 : vector<8x32xf32>
    %250 = arith.truncf %249 : vector<8x32xf32> to vector<8x32xbf16>
    %251 = arith.index_cast %c5_i32 : i32 to index
    %c0_81 = arith.constant 0 : index
    %c0_82 = arith.constant 0 : index
    %252 = vector.load %arg7[%251, %c0_81, %c0_82] : memref<8x8x32xbf16, #tpu.memory_space<vmem>>, vector<1x8x32xbf16>
    %253 = vector.shape_cast %252 : vector<1x8x32xbf16> to vector<8x32xbf16>
    %254 = vector.shape_cast %250 : vector<8x32xbf16> to vector<1x8x32xbf16>
    tpu.vector_store %arg7[%251, %c0_81, %c0_82], %254 {strides = array<i32>} : memref<8x8x32xbf16, #tpu.memory_space<vmem>>, vector<1x8x32xbf16>,
    %c6_i32 = arith.constant 6 : i32
    %255 = arith.index_cast %c6_i32 : i32 to index
    %c0_83 = arith.constant 0 : index
    %c0_84 = arith.constant 0 : index
    %256 = vector.load %arg9[%255, %c0_83, %c0_84] : memref<8x8x96xf32, #tpu.memory_space<vmem>>, vector<1x8x96xf32>
    %257 = vector.shape_cast %256 : vector<1x8x96xf32> to vector<8x96xf32>
    %258 = arith.truncf %249 : vector<8x32xf32> to vector<8x32xbf16>
    %cst_85 = arith.constant dense<0.000000e+00> : vector<8x96xf32>
    %259 = tpu.matmul %258, %12, %cst_85 {dimension_numbers = #tpu.dot_dimension_numbers<[1], [0], [0], [1], [0, 0, 1, 1], [], []>} : vector<8x32xbf16>, vector<32x96xbf16>, vector<8x96xf32> -> vector<8x96xf32>
    %260 = vector.extract_strided_slice %257 {offsets = [0, 0], sizes = [8, 32], strides = [1, 1]} : vector<8x96xf32> to vector<8x32xf32>
    %261 = vector.extract_strided_slice %259 {offsets = [0, 0], sizes = [8, 32], strides = [1, 1]} : vector<8x96xf32> to vector<8x32xf32>
    %262 = arith.addf %260, %261 : vector<8x32xf32>
    %cst_86 = arith.constant 5.000000e-01 : f32
    %263 = vector.broadcast %cst_86 : f32 to vector<8x32xf32>
    %264 = arith.mulf %263, %262 : vector<8x32xf32>
    %265 = math.tanh %264 : vector<8x32xf32>
    %cst_87 = arith.constant 5.000000e-01 : f32
    %266 = vector.broadcast %cst_87 : f32 to vector<8x32xf32>
    %267 = arith.mulf %266, %265 : vector<8x32xf32>
    %cst_88 = arith.constant 5.000000e-01 : f32
    %268 = vector.broadcast %cst_88 : f32 to vector<8x32xf32>
    %269 = arith.addf %267, %268 : vector<8x32xf32>
    %270 = vector.extract_strided_slice %257 {offsets = [0, 32], sizes = [8, 32], strides = [1, 1]} : vector<8x96xf32> to vector<8x32xf32>
    %271 = vector.extract_strided_slice %259 {offsets = [0, 32], sizes = [8, 32], strides = [1, 1]} : vector<8x96xf32> to vector<8x32xf32>
    %272 = arith.addf %270, %271 : vector<8x32xf32>
    %cst_89 = arith.constant 5.000000e-01 : f32
    %273 = vector.broadcast %cst_89 : f32 to vector<8x32xf32>
    %274 = arith.mulf %273, %272 : vector<8x32xf32>
    %275 = math.tanh %274 : vector<8x32xf32>
    %cst_90 = arith.constant 5.000000e-01 : f32
    %276 = vector.broadcast %cst_90 : f32 to vector<8x32xf32>
    %277 = arith.mulf %276, %275 : vector<8x32xf32>
    %cst_91 = arith.constant 5.000000e-01 : f32
    %278 = vector.broadcast %cst_91 : f32 to vector<8x32xf32>
    %279 = arith.addf %277, %278 : vector<8x32xf32>
    %280 = vector.extract_strided_slice %257 {offsets = [0, 64], sizes = [8, 32], strides = [1, 1]} : vector<8x96xf32> to vector<8x32xf32>
    %281 = vector.extract_strided_slice %259 {offsets = [0, 64], sizes = [8, 32], strides = [1, 1]} : vector<8x96xf32> to vector<8x32xf32>
    %282 = vector.broadcast %13 : vector<1x32xf32> to vector<8x32xf32>
    %283 = arith.addf %281, %282 : vector<8x32xf32>
    %284 = arith.mulf %269, %283 : vector<8x32xf32>
    %285 = arith.addf %280, %284 : vector<8x32xf32>
    %286 = math.tanh %285 : vector<8x32xf32>
    %287 = arith.subf %249, %286 : vector<8x32xf32>
    %288 = arith.mulf %279, %287 : vector<8x32xf32>
    %289 = arith.addf %286, %288 : vector<8x32xf32>
    %290 = arith.truncf %289 : vector<8x32xf32> to vector<8x32xbf16>
    %291 = arith.index_cast %c6_i32 : i32 to index
    %c0_92 = arith.constant 0 : index
    %c0_93 = arith.constant 0 : index
    %292 = vector.load %arg7[%291, %c0_92, %c0_93] : memref<8x8x32xbf16, #tpu.memory_space<vmem>>, vector<1x8x32xbf16>
    %293 = vector.shape_cast %292 : vector<1x8x32xbf16> to vector<8x32xbf16>
    %294 = vector.shape_cast %290 : vector<8x32xbf16> to vector<1x8x32xbf16>
    tpu.vector_store %arg7[%291, %c0_92, %c0_93], %294 {strides = array<i32>} : memref<8x8x32xbf16, #tpu.memory_space<vmem>>, vector<1x8x32xbf16>,
    %c7_i32 = arith.constant 7 : i32
    %295 = arith.index_cast %c7_i32 : i32 to index
    %c0_94 = arith.constant 0 : index
    %c0_95 = arith.constant 0 : index
    %296 = vector.load %arg9[%295, %c0_94, %c0_95] : memref<8x8x96xf32, #tpu.memory_space<vmem>>, vector<1x8x96xf32>
    %297 = vector.shape_cast %296 : vector<1x8x96xf32> to vector<8x96xf32>
    %298 = arith.truncf %289 : vector<8x32xf32> to vector<8x32xbf16>
    %cst_96 = arith.constant dense<0.000000e+00> : vector<8x96xf32>
    %299 = tpu.matmul %298, %12, %cst_96 {dimension_numbers = #tpu.dot_dimension_numbers<[1], [0], [0], [1], [0, 0, 1, 1], [], []>} : vector<8x32xbf16>, vector<32x96xbf16>, vector<8x96xf32> -> vector<8x96xf32>
    %300 = vector.extract_strided_slice %297 {offsets = [0, 0], sizes = [8, 32], strides = [1, 1]} : vector<8x96xf32> to vector<8x32xf32>
    %301 = vector.extract_strided_slice %299 {offsets = [0, 0], sizes = [8, 32], strides = [1, 1]} : vector<8x96xf32> to vector<8x32xf32>
    %302 = arith.addf %300, %301 : vector<8x32xf32>
    %cst_97 = arith.constant 5.000000e-01 : f32
    %303 = vector.broadcast %cst_97 : f32 to vector<8x32xf32>
    %304 = arith.mulf %303, %302 : vector<8x32xf32>
    %305 = math.tanh %304 : vector<8x32xf32>
    %cst_98 = arith.constant 5.000000e-01 : f32
    %306 = vector.broadcast %cst_98 : f32 to vector<8x32xf32>
    %307 = arith.mulf %306, %305 : vector<8x32xf32>
    %cst_99 = arith.constant 5.000000e-01 : f32
    %308 = vector.broadcast %cst_99 : f32 to vector<8x32xf32>
    %309 = arith.addf %307, %308 : vector<8x32xf32>
    %310 = vector.extract_strided_slice %297 {offsets = [0, 32], sizes = [8, 32], strides = [1, 1]} : vector<8x96xf32> to vector<8x32xf32>
    %311 = vector.extract_strided_slice %299 {offsets = [0, 32], sizes = [8, 32], strides = [1, 1]} : vector<8x96xf32> to vector<8x32xf32>
    %312 = arith.addf %310, %311 : vector<8x32xf32>
    %cst_100 = arith.constant 5.000000e-01 : f32
    %313 = vector.broadcast %cst_100 : f32 to vector<8x32xf32>
    %314 = arith.mulf %313, %312 : vector<8x32xf32>
    %315 = math.tanh %314 : vector<8x32xf32>
    %cst_101 = arith.constant 5.000000e-01 : f32
    %316 = vector.broadcast %cst_101 : f32 to vector<8x32xf32>
    %317 = arith.mulf %316, %315 : vector<8x32xf32>
    %cst_102 = arith.constant 5.000000e-01 : f32
    %318 = vector.broadcast %cst_102 : f32 to vector<8x32xf32>
    %319 = arith.addf %317, %318 : vector<8x32xf32>
    %320 = vector.extract_strided_slice %297 {offsets = [0, 64], sizes = [8, 32], strides = [1, 1]} : vector<8x96xf32> to vector<8x32xf32>
    %321 = vector.extract_strided_slice %299 {offsets = [0, 64], sizes = [8, 32], strides = [1, 1]} : vector<8x96xf32> to vector<8x32xf32>
    %322 = vector.broadcast %13 : vector<1x32xf32> to vector<8x32xf32>
    %323 = arith.addf %321, %322 : vector<8x32xf32>
    %324 = arith.mulf %309, %323 : vector<8x32xf32>
    %325 = arith.addf %320, %324 : vector<8x32xf32>
    %326 = math.tanh %325 : vector<8x32xf32>
    %327 = arith.subf %289, %326 : vector<8x32xf32>
    %328 = arith.mulf %319, %327 : vector<8x32xf32>
    %329 = arith.addf %326, %328 : vector<8x32xf32>
    %330 = arith.truncf %329 : vector<8x32xf32> to vector<8x32xbf16>
    %331 = arith.index_cast %c7_i32 : i32 to index
    %c0_103 = arith.constant 0 : index
    %c0_104 = arith.constant 0 : index
    %332 = vector.load %arg7[%331, %c0_103, %c0_104] : memref<8x8x32xbf16, #tpu.memory_space<vmem>>, vector<1x8x32xbf16>
    %333 = vector.shape_cast %332 : vector<1x8x32xbf16> to vector<8x32xbf16>
    %334 = vector.shape_cast %330 : vector<8x32xbf16> to vector<1x8x32xbf16>
    tpu.vector_store %arg7[%331, %c0_103, %c0_104], %334 {strides = array<i32>} : memref<8x8x32xbf16, #tpu.memory_space<vmem>>, vector<1x8x32xbf16>,
    %c8_i32 = arith.constant 8 : i32
    %c0_105 = arith.constant 0 : index
    %c0_106 = arith.constant 0 : index
    %335 = vector.load %arg8[%c0_105, %c0_106] : memref<8x32xf32, #tpu.memory_space<vmem>>, vector<8x32xf32>
    tpu.vector_store %arg8[%c0_105, %c0_106], %329 {strides = array<i32>} : memref<8x32xf32, #tpu.memory_space<vmem>>, vector<8x32xf32>,
    return
  }
  func.func @transform_0(%arg0: i32, %arg1: i32) -> (i32, i32, i32) {
    %c0_i32 = arith.constant 0 : i32
    %c0_i32_0 = arith.constant 0 : i32
    return %arg1, %arg0, %c0_i32 : i32, i32, i32
  }
  func.func @transform_1(%arg0: i32, %arg1: i32) -> (i32, i32) {
    %c0_i32 = arith.constant 0 : i32
    %c0_i32_0 = arith.constant 0 : i32
    %c0_i32_1 = arith.constant 0 : i32
    return %c0_i32, %c0_i32_0 : i32, i32
  }
  func.func @transform_2(%arg0: i32, %arg1: i32) -> (i32, i32) {
    %c0_i32 = arith.constant 0 : i32
    %c0_i32_0 = arith.constant 0 : i32
    %c0_i32_1 = arith.constant 0 : i32
    return %c0_i32, %c0_i32_0 : i32, i32
  }
  func.func @transform_3(%arg0: i32, %arg1: i32) -> (i32, i32) {
    %c0_i32 = arith.constant 0 : i32
    %c0_i32_0 = arith.constant 0 : i32
    %c0_i32_1 = arith.constant 0 : i32
    return %c0_i32, %c0_i32_0 : i32, i32
  }
  func.func @transform_4(%arg0: i32, %arg1: i32) -> (i32, i32) {
    %c0_i32 = arith.constant 0 : i32
    %c0_i32_0 = arith.constant 0 : i32
    %c0_i32_1 = arith.constant 0 : i32
    return %c0_i32, %c0_i32_0 : i32, i32
  }
  func.func @transform_5(%arg0: i32, %arg1: i32) -> (i32, i32, i32) {
    %c0_i32 = arith.constant 0 : i32
    %c0_i32_0 = arith.constant 0 : i32
    return %arg1, %arg0, %c0_i32 : i32, i32, i32
  }
}

</mosaic_0001>

<bundles_post_ra>
// kernel: tpu_custom_call.1
= control target key start
LH: loop header
LB: loop body
LE: loop exit
PB: predicated region body
PF: predicated region fallthrough
CT: control target
= control target key end

     0   :  { %10 = vsyncpa [#allocation5], 0  ;;  %s1508_s0 = inlined_call_operand.hbm [shape: bf16[8,8,32], index: 0, kind: input, shape index: {}]   ;;  %s1509_s1 = inlined_call_operand.hbm [shape: bf16[32,96], index: 1, kind: input, shape index: {}]   ;;  %s1510_s2 = inlined_call_operand.vmem [shape: f32[1,96], index: 2, kind: input, shape index: {}]   ;;  %s1511_s3 = inlined_call_operand.hbm [shape: bf16[32,96], index: 3, kind: input, shape index: {}]   ;;  %s1512_s4 = inlined_call_operand.vmem [shape: f32[1,32], index: 4, kind: input, shape index: {}]   ;;  %s1513_s5 = inlined_call_operand.hbm [shape: bf16[8,8,32], index: 5, kind: output, shape index: {}]  }
   0x1   :  { %11 = vsyncpa [#allocation8], 0 }
   0x2   :  { %12 = vsyncpa [#allocation6], 0  ;;  %s1218_s18 = smov [#allocation7]   ;;  %s1219_s20 = smov [#allocation4]  }
   0x3   :  { %s30_s19 = sshll.u32 %s1218_s18, 4  ;;  %s18_s21 = sshll.u32 %s1219_s20, 4  ;;  %s31_s19 = int_to_ptr.vmem [resolvable:$true] %s30_s19  ;;  %s1258_s21 = int_to_ptr.vmem [resolvable:$true] %s18_s21 }
   0x4   :  { %s1124_s24 = scalar_lea.hbm %s1509_s1, 256 }
   0x5   :  { %p1125_p0 = scmp.ne.s32.totalorder %s1509_s1, %s1124_s24  ;;  %p1128_p1 = scmp.lt.u32.totalorder %s1124_s24, %s1509_s1 }
   0x7   :  { %p1130_p2 = pnand %p1128_p1, %p1125_p0 }
   0x9   :  { %1133 = shalt.err (!%p1130_p2)
}
   0xa   :  { %s1134_s29 = scalar_lea.vmem %s31_s19, 256  ;;  %p1139_p4 = scmp.lt.s32.totalorder %s31_s19, %s31_s19 }
   0xb   :  { %p1135_p3 = scmp.ne.s32.totalorder %s31_s19, %s1134_s29  ;;  %p1140_p5 = scmp.lt.s32.totalorder %s1134_s29, %s1134_s29 }
   0xd   :  { %p1141_p6 = por %p1140_p5, %p1139_p4 }
   0xf   :  { %p1142_p7 = pnand %p1141_p6, %p1135_p3 }
  0x11   :  { %1145 = shalt.err (!%p1142_p7)
}
  0x12   :  { %s1220_s30 = smov 64   ;;  %s1221_s6 = smov 4  }
  0x13   :  { %36 = dma.hbm_to_vmem [thread:$0]  %s1509_s1, 256, %s31_s19, [#allocation8], %s1220_s30, %s1220_s30, %s1221_s6  }
  0x14   :  { %s1146_s11 = scalar_lea.hbm %s1508_s0, 512 }
  0x15   :  { %p1147_p8 = scmp.ne.s32.totalorder %s1508_s0, %s1146_s11  ;;  %p1150_p9 = scmp.lt.u32.totalorder %s1146_s11, %s1508_s0 }
  0x17   :  { %p1152_p10 = pnand %p1150_p9, %p1147_p8 }
  0x19   :  { %1155 = shalt.err (!%p1152_p10)
}
  0x1a   :  { %s1156_s16 = scalar_lea.vmem %s1258_s21, 512  ;;  %p1161_p12 = scmp.lt.s32.totalorder %s1258_s21, %s1258_s21 }
  0x1b   :  { %p1157_p11 = scmp.ne.s32.totalorder %s1258_s21, %s1156_s16  ;;  %p1162_p13 = scmp.lt.s32.totalorder %s1156_s16, %s1156_s16 }
  0x1d   :  { %p1163_p0 = por %p1162_p13, %p1161_p12 }
  0x1f   :  { %p1164_p1 = pnand %p1163_p0, %p1157_p11 }
  0x21   :  { %1167 = shalt.err (!%p1164_p1)
}
  0x22   :  { %24 = dma.hbm_to_vmem [thread:$0]  %s1508_s0, 512, %s1258_s21, [#allocation5], %s1220_s30, %s1220_s30, %s1221_s6  }
  0x23   :  { %s1222_s18 = smov [#allocation9]   ;;  %s1168_s23 = scalar_lea.hbm %s1511_s3, 256 }
  0x24   :  { %s44_s19 = sshll.u32 %s1222_s18, 4  ;;  %p1169_p2 = scmp.ne.s32.totalorder %s1511_s3, %s1168_s23  ;;  %s45_s19 = int_to_ptr.vmem [resolvable:$true] %s44_s19 }
  0x25   :  { %p1172_p3 = scmp.lt.u32.totalorder %s1168_s23, %s1511_s3 }
  0x27   :  { %p1174_p4 = pnand %p1172_p3, %p1169_p2 }
  0x29   :  { %1177 = shalt.err (!%p1174_p4)
}
  0x2a   :  { %s1178_s28 = scalar_lea.vmem %s45_s19, 256  ;;  %p1183_p6 = scmp.lt.s32.totalorder %s45_s19, %s45_s19 }
  0x2b   :  { %p1179_p5 = scmp.ne.s32.totalorder %s45_s19, %s1178_s28  ;;  %p1184_p7 = scmp.lt.s32.totalorder %s1178_s28, %s1178_s28 }
  0x2d   :  { %p1185_p8 = por %p1184_p7, %p1183_p6 }
  0x2f   :  { %p1186_p9 = pnand %p1185_p8, %p1179_p5 }
  0x31   :  { %1189 = shalt.err (!%p1186_p9)
}
  0x32   :  { %50 = dma.hbm_to_vmem [thread:$0]  %s1511_s3, 256, %s45_s19, [#allocation8], %s1220_s30, %s1220_s30, %s1221_s6  }
  0x33   :  { %1212 = dma.done.wait [#allocation5], 512  }
  0x34   :  { %1213 = vsyncadd [#allocation5], 4294966784 }
  0x35   :  { %1214 = dma.done.wait [#allocation8], 512  }
  0x36   :  { %1215 = vsyncadd [#allocation8], 4294966784  ;;  %vm67_vm0 = vcmask 261120   ;;  %v1223_v0 = vmov 0.0   ;;  %vm1224_vm1 = vmmov 0   ;;  %v1084_v1 = vld [vmem:[#allocation7] sm:$0xff]  }
  0x37   :  { %1010 = vmatprep.subr.bf16.mxu1 %v1223_v0  ;;  %1014 = vmatprep.mubr.msk.bf16.mxu1 %vm1224_vm1, %v1223_v0  ;;  %68 = vst.msk [vmem:[#allocation2] sm:$0xff] %vm67_vm0, %v1223_v0  ;;  %v1315_v2 = vld [vmem:[#allocation9] sm:$0xff]   ;;  %v1086_v3 = vld [vmem:[#allocation7 + $0x8] sm:$0xff]   ;;  %v1318_v4 = vld [vmem:[#allocation9 + $0x8] sm:$0xff]   ;;  %vm198_vm2 = vcmask 785408   ;;  %s1226_s8 = smov 96  }
  0x38   :  { %998 = vmatprep.subr.bf16.mxu0 %v1084_v1  ;;  %1011 = vmatpush3.bf16.msra.mxu1 %v1315_v2  ;;  %v1088_v5 = vld [vmem:[#allocation4] sm:$0xff]   ;;  %v1089_v8 = vld [vmem:[#allocation4 + $0x8] sm:$0xff]   ;;  %v944_v9 = vld [vmem:[%s1512_s4] ss:$0 sm:$0xff]  ;;  %vm317_vm3 = vcmask 257024   ;;  %s1227_s9 = smov [#allocation10]  }
  0x39   :  { %999 = vmatpush3.bf16.msra.mxu0 %v1084_v1  ;;  %1012 = vmatprep.subr.bf16.mxu1 %v1223_v0  ;;  %v1346_v11 = vld [vmem:[%s1510_s2] ss:$0 sm:$0xff]  ;;  %s1225_s2 = smov 32   ;;  %v1090_v61 = vld [vmem:[#allocation4 + $0x10] sm:$0xff]   ;;  %s917_s10 = sshll.u32 %s1227_s9, 4  ;;  %s918_s10 = int_to_ptr.vmem [resolvable:$true] %s917_s10 }
  0x3a   :  { %1000 = vmatprep.subr.bf16.mxu0 %v1086_v3  ;;  %1002 = vmatprep.mubr.msk.bf16.mxu0 %vm67_vm0, %v1088_v5  ;;  %v1091_v62 = vld [vmem:[#allocation4 + $0x18] sm:$0xff]   ;;  %s1190_s11 = scalar_lea.vmem %s918_s10, 512  ;;  %p1195_p11 = scmp.lt.s32.totalorder %s918_s10, %s918_s10 }
  0x3b   :  { %280 = vrot.lane.b32.xlu0 %v944_v9, %s1220_s30  ;;  %p1191_p10 = scmp.ne.s32.totalorder %s918_s10, %s1190_s11  ;;  %p1196_p12 = scmp.lt.s32.totalorder %s1190_s11, %s1190_s11 }
  0x3c   :  { %1013 = vmatpush3.bf16.msra.mxu1 %v1318_v4 }
  0x3d   :  { %1001 = vmatpush3.bf16.msra.mxu0 %v1086_v3  ;;  %1018 = vmatprep.subr.bf16.mxu1 %v1223_v0  ;;  %p1197_p13 = por %p1196_p12, %p1195_p11 }
  0x3e   :  { %v212_v6 = vld [vmem:[#allocation2] sm:$0xff]  ;;  %1026 = vmatprep.subr.bf16.mxu0 %v1223_v0 }
  0x3f   :  { %v214_v7 = vpack.c.bf16 %v212_v6, %v212_v6  ;;  %p1198_p0 = pnand %p1197_p13, %p1191_p10 }
  0x40   :  { %1003 = vmatmul.mubr.msk.bf16.vlgmr.msra.gmra.mrb[0].mxu0 %vm67_vm0, %v1089_v8 }
  0x41   :  { %1015 = vmatmul.mubr.msk.bf16.vlgmr.msra.gmra.mrb[0].mxu1 %vm67_vm0, %v214_v7  ;;  %1027 = vmatpush3.bf16.msra.mxu0 %v1315_v2 }
  0x42   :  { %1019 = vmatpush3.bf16.msra.mxu1 %v1315_v2  ;;  %1022 = vmatprep.mubr.msk.bf16.mxu1 %vm1224_vm1, %v1223_v0 }
  0x43   :  { %1020 = vmatprep.subr.bf16.mxu1 %v1223_v0  ;;  %1028 = vmatprep.subr.bf16.mxu0 %v1223_v0 }
  0x44   :  { %1006 = vmatprep.mubr.msk.bf16.mxu0 %vm67_vm0, %v1090_v61 }
  0x45   :  { %1029 = vmatpush3.bf16.msra.mxu0 %v1318_v4 }
  0x46   :  { %1021 = vmatpush3.bf16.msra.mxu1 %v1318_v4  ;;  %1042 = vmatprep.subr.bf16.mxu0 %v1223_v0 }
  0x47   :  { %1034 = vmatprep.subr.bf16.mxu1 %v1223_v0 }
  0x48   :  { %1007 = vmatmul.mubr.msk.bf16.gmra.mrb[4].mxu0 %vm67_vm0, %v1091_v62 }
  0x49   :  { %1030 = vmatprep.mubr.msk.bf16.mxu0 %vm1224_vm1, %v1223_v0 }
  0xad   :  { %v1341_v10 = vpop.permute.xlu0 %280 }
 0x113   :  { %v1004_v13 = vpop.f32.mrb[0].mxu0 }
 0x114   :  { %v264_v12 = vpop.f32.mrb[0].mxu1  ;;  %v176_v14 = vadd.f32 %v1004_v13, %v1346_v11  ;;  %v167_v16 = vpop.f32.mrb[1].mxu0 }
 0x115   :  { %v1016_v15 = vpop.f32.mrb[1].mxu1  ;;  %v283_v17 = vadd.f32 %v1341_v10, %v264_v12  ;;  %v168_v18 = vadd.f32 %v1346_v11, %v167_v16  ;;  %v1005_v20 = vpop.f32.mrb[2].mxu0 }
 0x116   :  { %v267_v19 = vpop.f32.mrb[2].mxu1  ;;  %201 = vst.msk [vmem:[#allocation3 + $0x10] sm:$0xff] %vm198_vm2, %v176_v14  ;;  %v179_v22 = vadd.f32 %v1005_v20, %v1346_v11  ;;  %v170_v23 = vpop.f32.mrb[3].mxu0 }
 0x117   :  { %285 = vrot.lane.b32.xlu0 %v283_v17, %s1220_s30  ;;  %v1017_v21 = vpop.f32.mrb[3].mxu1  ;;  %199 = vst.msk [vmem:[#allocation3] sm:$0xff] %vm198_vm2, %v168_v18  ;;  %v171_v24 = vadd.f32 %v1346_v11, %v170_v23 }
 0x118   :  { %202 = vst.msk [vmem:[#allocation3 + $0x18] sm:$0xff] %vm198_vm2, %v179_v22 }
 0x119   :  { %200 = vst.msk [vmem:[#allocation3 + $0x8] sm:$0xff] %vm198_vm2, %v171_v24 }
 0x11b   :  { %v1008_v7 = vpop.f32.mrb[4].mxu0 }
 0x11c   :  { %v192_v8 = vadd.f32 %v1008_v7, %v1346_v11  ;;  %v183_v9 = vpop.f32.mrb[5].mxu0 }
 0x11d   :  { %v1009_v13 = vpop.f32.mrb[6].mxu0  ;;  %v404_v22 = vld [vmem:[#allocation3 + $0x10] sm:$0xff] }
 0x11e   :  { %v213_v25 = vld [vmem:[#allocation3] sm:$0xff]  ;;  %205 = vst.msk [vmem:[#allocation3 + $0x30] sm:$0xff] %vm198_vm2, %v192_v8  ;;  %v195_v14 = vadd.f32 %v1009_v13, %v1346_v11  ;;  %v186_v15 = vpop.f32.mrb[7].mxu0 }
 0x11f   :  { %v270_v26 = vadd.f32 %v264_v12, %v213_v25  ;;  %v184_v12 = vadd.f32 %v1346_v11, %v183_v9  ;;  %v187_v16 = vadd.f32 %v1346_v11, %v186_v15 }
 0x120   :  { %v320_v49 = vld [vmem:[#allocation3 + $0x8] sm:$0xff]  ;;  %206 = vst.msk [vmem:[#allocation3 + $0x38] sm:$0xff] %vm198_vm2, %v195_v14 }
 0x121   :  { %v271_v27 = vmul.f32 0.5, %v270_v26  ;;  %203 = vst.msk [vmem:[#allocation3 + $0x20] sm:$0xff] %vm198_vm2, %v184_v12  ;;  %204 = vst.msk [vmem:[#allocation3 + $0x28] sm:$0xff] %vm198_vm2, %v187_v16 }
 0x123   :  { %1092 = vtanh.f32 %v271_v27 }
 0x128   :  { %v572_v9 = vld [vmem:[#allocation3 + $0x20] sm:$0xff] }
 0x12d   :  { %v1093_v28 = vpop.eup %1092 }
 0x12e   :  { %v273_v29 = vmul.f32 0.5, %v1093_v28 }
 0x130   :  { %v274_v30 = vadd.f32 0.5, %v273_v29 }
 0x189   :  { %v286_v31 = vpop.permute.xlu0 %285 }
 0x18a   :  { %v288_v32 = vmul.f32 %v286_v31, %v274_v30 }
 0x18c   :  { %290 = vrot.lane.b32.xlu1 %v288_v32, %s1220_s30 }
 0x1fe   :  { %v291_v33 = vpop.permute.xlu1 %290 }
 0x1ff   :  { %v293_v34 = vadd.f32 %v291_v33, %v213_v25 }
 0x201   :  { %1094 = vtanh.f32 %v293_v34 }
 0x20b   :  { %v1095_v35 = vpop.eup %1094 }
 0x20c   :  { %296 = vrot.lane.b32.xlu1 %v1095_v35, %s1220_s30 }
 0x27e   :  { %v297_v36 = vpop.permute.xlu1 %296 }
 0x27f   :  { %v299_v37 = vsub.f32 %v212_v6, %v297_v36 }
 0x281   :  { %301 = vrot.lane.b32.xlu0 %v299_v37, %s1225_s2 }
 0x2f3   :  { %v302_v38 = vpop.permute.xlu0 %301 }
 0x2f4   :  { %v304_v39 = vmul.f32 %v302_v38, %v274_v30 }
 0x2f6   :  { %306 = vrot.lane.b32.xlu1 %v304_v39, %s1225_s2 }
 0x368   :  { %v307_v40 = vpop.permute.xlu1 %306 }
 0x369   :  { %v309_v41 = vadd.f32 %v1095_v35, %v307_v40 }
 0x36b   :  { %v1362_v42 = vpack.c.bf16 %v309_v41, %v309_v41 }
 0x36d   :  { %321 = vrot.lane.b32.xlu0 %v1362_v42, %s1220_s30 }
 0x3df   :  { %v322_v43 = vpop.permute.xlu0 %321 }
 0x3e0   :  { %1023 = vmatmul.mubr.msk.bf16.vlgmr.msra.gmra.mrb[4].mxu1 %vm67_vm0, %v322_v43 }
 0x3e1   :  { %1035 = vmatpush3.bf16.msra.mxu1 %v1315_v2  ;;  %1038 = vmatprep.mubr.msk.bf16.mxu1 %vm1224_vm1, %v1223_v0 }
 0x3e2   :  { %1036 = vmatprep.subr.bf16.mxu1 %v1223_v0 }
 0x3e5   :  { %1037 = vmatpush3.bf16.msra.mxu1 %v1318_v4 }
 0x3e6   :  { %1050 = vmatprep.subr.bf16.mxu1 %v1223_v0 }
 0x4b3   :  { %v360_v44 = vpop.f32.mrb[4].mxu1 }
 0x4b4   :  { %v1024_v45 = vpop.f32.mrb[5].mxu1  ;;  %v371_v46 = vadd.f32 %v360_v44, %v1341_v10  ;;  %v366_v50 = vadd.f32 %v360_v44, %v320_v49 }
 0x4b5   :  { %v363_v47 = vpop.f32.mrb[6].mxu1 }
 0x4b6   :  { %373 = vrot.lane.b32.xlu1 %v371_v46, %s1220_s30  ;;  %v1025_v48 = vpop.f32.mrb[7].mxu1  ;;  %v367_v51 = vmul.f32 0.5, %v366_v50  ;;  %v488_v46 = vld [vmem:[#allocation3 + $0x18] sm:$0xff] }
 0x4b8   :  { %1096 = vtanh.f32 %v367_v51 }
 0x4c2   :  { %v1097_v52 = vpop.eup %1096 }
 0x4c3   :  { %v369_v53 = vmul.f32 0.5, %v1097_v52 }
 0x4c5   :  { %v370_v54 = vadd.f32 0.5, %v369_v53 }
 0x528   :  { %v374_v55 = vpop.permute.xlu1 %373 }
 0x529   :  { %v376_v56 = vmul.f32 %v374_v55, %v370_v54 }
 0x52b   :  { %378 = vrot.lane.b32.xlu0 %v376_v56, %s1220_s30 }
 0x59d   :  { %v379_v57 = vpop.permute.xlu0 %378 }
 0x59e   :  { %v381_v58 = vadd.f32 %v379_v57, %v320_v49 }
 0x5a0   :  { %1098 = vtanh.f32 %v381_v58 }
 0x5aa   :  { %v1099_v59 = vpop.eup %1098 }
 0x5ab   :  { %v383_v60 = vsub.f32 %v309_v41, %v1099_v59 }
 0x5ad   :  { %385 = vrot.lane.b32.xlu1 %v383_v60, %s1226_s8 }
 0x61f   :  { %v386_v63 = vpop.permute.xlu1 %385 }
 0x620   :  { %v388_v1 = vmul.f32 %v386_v63, %v370_v54 }
 0x622   :  { %390 = vrot.lane.b32.xlu0 %v388_v1, %s1225_s2 }
 0x694   :  { %v391_v3 = vpop.permute.xlu0 %390 }
 0x695   :  { %v393_v5 = vadd.f32 %v1099_v59, %v391_v3 }
 0x697   :  { %v1382_v6 = vpack.c.bf16 %v393_v5, %v393_v5 }
 0x699   :  { %405 = vrot.lane.b32.xlu1 %v1382_v6, %s1220_s30 }
 0x70b   :  { %v406_v17 = vpop.permute.xlu1 %405 }
 0x70c   :  { %1031 = vmatmul.mubr.msk.bf16.vlgmr.msra.gmra.mrb[8].mxu0 %vm67_vm0, %v406_v17 }
 0x70d   :  { %1043 = vmatpush3.bf16.msra.mxu0 %v1315_v2  ;;  %1046 = vmatprep.mubr.msk.bf16.mxu0 %vm1224_vm1, %v1223_v0 }
 0x70e   :  { %1044 = vmatprep.subr.bf16.mxu0 %v1223_v0 }
 0x711   :  { %1045 = vmatpush3.bf16.msra.mxu0 %v1318_v4 }
 0x712   :  { %1058 = vmatprep.subr.bf16.mxu0 %v1223_v0 }
 0x7df   :  { %v444_v18 = vpop.f32.mrb[8].mxu0 }
 0x7e0   :  { %v1032_v11 = vpop.f32.mrb[9].mxu0  ;;  %v455_v19 = vadd.f32 %v444_v18, %v1341_v10  ;;  %v450_v23 = vadd.f32 %v444_v18, %v404_v22 }
 0x7e1   :  { %v447_v20 = vpop.f32.mrb[10].mxu0 }
 0x7e2   :  { %457 = vrot.lane.b32.xlu0 %v455_v19, %s1220_s30  ;;  %v1033_v21 = vpop.f32.mrb[11].mxu0  ;;  %v451_v24 = vmul.f32 0.5, %v450_v23 }
 0x7e4   :  { %1100 = vtanh.f32 %v451_v24 }
 0x7ee   :  { %v1101_v25 = vpop.eup %1100 }
 0x7ef   :  { %v453_v26 = vmul.f32 0.5, %v1101_v25 }
 0x7f1   :  { %v454_v27 = vadd.f32 0.5, %v453_v26 }
 0x854   :  { %v458_v28 = vpop.permute.xlu0 %457 }
 0x855   :  { %v460_v29 = vmul.f32 %v458_v28, %v454_v27 }
 0x857   :  { %462 = vrot.lane.b32.xlu1 %v460_v29, %s1220_s30 }
 0x8c9   :  { %v463_v30 = vpop.permute.xlu1 %462 }
 0x8ca   :  { %v465_v31 = vadd.f32 %v463_v30, %v404_v22 }
 0x8cc   :  { %1102 = vtanh.f32 %v465_v31 }
 0x8d6   :  { %v1103_v32 = vpop.eup %1102 }
 0x8d7   :  { %v467_v33 = vsub.f32 %v393_v5, %v1103_v32 }
 0x8d9   :  { %469 = vrot.lane.b32.xlu0 %v467_v33, %s1226_s8  ;;  %v656_v33 = vld [vmem:[#allocation3 + $0x28] sm:$0xff] }
 0x94b   :  { %v470_v34 = vpop.permute.xlu0 %469 }
 0x94c   :  { %v472_v35 = vmul.f32 %v470_v34, %v454_v27 }
 0x94e   :  { %474 = vrot.lane.b32.xlu1 %v472_v35, %s1225_s2 }
 0x9c0   :  { %v475_v36 = vpop.permute.xlu1 %474 }
 0x9c1   :  { %v477_v37 = vadd.f32 %v1103_v32, %v475_v36 }
 0x9c3   :  { %v1406_v38 = vpack.c.bf16 %v477_v37, %v477_v37 }
 0x9c5   :  { %489 = vrot.lane.b32.xlu0 %v1406_v38, %s1220_s30 }
 0xa37   :  { %v490_v39 = vpop.permute.xlu0 %489 }
 0xa38   :  { %1039 = vmatmul.mubr.msk.bf16.vlgmr.msra.gmra.mrb[8].mxu1 %vm67_vm0, %v490_v39 }
 0xa39   :  { %1051 = vmatpush3.bf16.msra.mxu1 %v1315_v2  ;;  %1054 = vmatprep.mubr.msk.bf16.mxu1 %vm1224_vm1, %v1223_v0 }
 0xa3a   :  { %1052 = vmatprep.subr.bf16.mxu1 %v1223_v0 }
 0xa3d   :  { %1053 = vmatpush3.bf16.msra.mxu1 %v1318_v4 }
 0xa3e   :  { %1066 = vmatprep.subr.bf16.mxu1 %v1223_v0 }
 0xb0b   :  { %v528_v40 = vpop.f32.mrb[8].mxu1 }
 0xb0c   :  { %v1040_v41 = vpop.f32.mrb[9].mxu1  ;;  %v539_v43 = vadd.f32 %v528_v40, %v1341_v10  ;;  %v534_v47 = vadd.f32 %v528_v40, %v488_v46 }
 0xb0d   :  { %v531_v44 = vpop.f32.mrb[10].mxu1 }
 0xb0e   :  { %541 = vrot.lane.b32.xlu1 %v539_v43, %s1220_s30  ;;  %v1041_v45 = vpop.f32.mrb[11].mxu1  ;;  %v535_v48 = vmul.f32 0.5, %v534_v47 }
 0xb10   :  { %1104 = vtanh.f32 %v535_v48 }
 0xb1a   :  { %v1105_v49 = vpop.eup %1104 }
 0xb1b   :  { %v537_v50 = vmul.f32 0.5, %v1105_v49 }
 0xb1d   :  { %v538_v51 = vadd.f32 0.5, %v537_v50 }
 0xb80   :  { %v542_v52 = vpop.permute.xlu1 %541 }
 0xb81   :  { %v544_v53 = vmul.f32 %v542_v52, %v538_v51 }
 0xb83   :  { %546 = vrot.lane.b32.xlu0 %v544_v53, %s1220_s30 }
 0xbf5   :  { %v547_v54 = vpop.permute.xlu0 %546 }
 0xbf6   :  { %v549_v55 = vadd.f32 %v547_v54, %v488_v46 }
 0xbf8   :  { %1106 = vtanh.f32 %v549_v55  ;;  %v740_v55 = vld [vmem:[#allocation3 + $0x30] sm:$0xff] }
 0xc02   :  { %v1107_v56 = vpop.eup %1106 }
 0xc03   :  { %v551_v57 = vsub.f32 %v477_v37, %v1107_v56 }
 0xc05   :  { %553 = vrot.lane.b32.xlu1 %v551_v57, %s1226_s8 }
 0xc77   :  { %v554_v58 = vpop.permute.xlu1 %553 }
 0xc78   :  { %v556_v59 = vmul.f32 %v554_v58, %v538_v51 }
 0xc7a   :  { %558 = vrot.lane.b32.xlu0 %v556_v59, %s1225_s2 }
 0xcec   :  { %v559_v60 = vpop.permute.xlu0 %558 }
 0xced   :  { %v561_v61 = vadd.f32 %v1107_v56, %v559_v60 }
 0xcef   :  { %v1422_v62 = vpack.c.bf16 %v561_v61, %v561_v61 }
 0xcf1   :  { %573 = vrot.lane.b32.xlu1 %v1422_v62, %s1220_s30 }
 0xd63   :  { %v574_v63 = vpop.permute.xlu1 %573 }
 0xd64   :  { %1047 = vmatmul.mubr.msk.bf16.vlgmr.msra.gmra.mrb[12].mxu0 %vm67_vm0, %v574_v63 }
 0xd65   :  { %1059 = vmatpush3.bf16.msra.mxu0 %v1315_v2  ;;  %1062 = vmatprep.mubr.msk.bf16.mxu0 %vm1224_vm1, %v1223_v0 }
 0xd66   :  { %1060 = vmatprep.subr.bf16.mxu0 %v1223_v0 }
 0xd69   :  { %1061 = vmatpush3.bf16.msra.mxu0 %v1318_v4 }
 0xe37   :  { %v612_v1 = vpop.f32.mrb[12].mxu0 }
 0xe38   :  { %v1048_v3 = vpop.f32.mrb[13].mxu0  ;;  %v623_v5 = vadd.f32 %v612_v1, %v1341_v10  ;;  %v618_v12 = vadd.f32 %v612_v1, %v572_v9 }
 0xe39   :  { %v615_v7 = vpop.f32.mrb[14].mxu0 }
 0xe3a   :  { %625 = vrot.lane.b32.xlu0 %v623_v5, %s1220_s30  ;;  %v1049_v8 = vpop.f32.mrb[15].mxu0  ;;  %v619_v13 = vmul.f32 0.5, %v618_v12 }
 0xe3c   :  { %1108 = vtanh.f32 %v619_v13 }
 0xe46   :  { %v1109_v14 = vpop.eup %1108 }
 0xe47   :  { %v621_v15 = vmul.f32 0.5, %v1109_v14 }
 0xe49   :  { %v622_v16 = vadd.f32 0.5, %v621_v15 }
 0xeac   :  { %v626_v17 = vpop.permute.xlu0 %625 }
 0xead   :  { %v628_v18 = vmul.f32 %v626_v17, %v622_v16 }
 0xeaf   :  { %630 = vrot.lane.b32.xlu1 %v628_v18, %s1220_s30 }
 0xf21   :  { %v631_v11 = vpop.permute.xlu1 %630 }
 0xf22   :  { %v633_v19 = vadd.f32 %v631_v11, %v572_v9 }
 0xf24   :  { %1110 = vtanh.f32 %v633_v19 }
 0xf2e   :  { %v1111_v20 = vpop.eup %1110 }
 0xf2f   :  { %v635_v21 = vsub.f32 %v561_v61, %v1111_v20 }
 0xf31   :  { %637 = vrot.lane.b32.xlu0 %v635_v21, %s1226_s8 }
 0xfa3   :  { %v638_v22 = vpop.permute.xlu0 %637 }
 0xfa4   :  { %v640_v23 = vmul.f32 %v638_v22, %v622_v16 }
 0xfa6   :  { %642 = vrot.lane.b32.xlu1 %v640_v23, %s1225_s2 }
0x1018   :  { %v643_v24 = vpop.permute.xlu1 %642 }
0x1019   :  { %v645_v25 = vadd.f32 %v1111_v20, %v643_v24  ;;  %v824_v20 = vld [vmem:[#allocation3 + $0x38] sm:$0xff] }
0x101b   :  { %v1437_v26 = vpack.c.bf16 %v645_v25, %v645_v25 }
0x101d   :  { %657 = vrot.lane.b32.xlu0 %v1437_v26, %s1220_s30 }
0x108f   :  { %v658_v27 = vpop.permute.xlu0 %657 }
0x1090   :  { %1055 = vmatmul.mubr.msk.bf16.vlgmr.msra.gmra.mrb[12].mxu1 %vm67_vm0, %v658_v27 }
0x1091   :  { %1067 = vmatpush3.bf16.msra.mxu1 %v1315_v2  ;;  %1070 = vmatprep.mubr.msk.bf16.mxu1 %vm1224_vm1, %v1223_v0 }
0x1092   :  { %1068 = vmatprep.subr.bf16.mxu1 %v1223_v0 }
0x1095   :  { %1069 = vmatpush3.bf16.msra.mxu1 %v1318_v4 }
0x1163   :  { %v696_v28 = vpop.f32.mrb[12].mxu1 }
0x1164   :  { %v1056_v29 = vpop.f32.mrb[13].mxu1  ;;  %v707_v30 = vadd.f32 %v696_v28, %v1341_v10  ;;  %v702_v34 = vadd.f32 %v696_v28, %v656_v33 }
0x1165   :  { %v699_v31 = vpop.f32.mrb[14].mxu1 }
0x1166   :  { %709 = vrot.lane.b32.xlu1 %v707_v30, %s1220_s30  ;;  %v1057_v32 = vpop.f32.mrb[15].mxu1  ;;  %v703_v35 = vmul.f32 0.5, %v702_v34 }
0x1168   :  { %1112 = vtanh.f32 %v703_v35 }
0x1172   :  { %v1113_v2 = vpop.eup %1112 }
0x1173   :  { %v705_v36 = vmul.f32 0.5, %v1113_v2 }
0x1175   :  { %v706_v37 = vadd.f32 0.5, %v705_v36 }
0x11d8   :  { %v710_v39 = vpop.permute.xlu1 %709 }
0x11d9   :  { %v712_v40 = vmul.f32 %v710_v39, %v706_v37 }
0x11db   :  { %714 = vrot.lane.b32.xlu0 %v712_v40, %s1220_s30 }
0x124d   :  { %v715_v0 = vpop.permute.xlu0 %714 }
0x124e   :  { %v717_v4 = vadd.f32 %v715_v0, %v656_v33 }
0x1250   :  { %1114 = vtanh.f32 %v717_v4 }
0x125a   :  { %v1115_v41 = vpop.eup %1114 }
0x125b   :  { %v719_v43 = vsub.f32 %v645_v25, %v1115_v41 }
0x125d   :  { %721 = vrot.lane.b32.xlu1 %v719_v43, %s1226_s8 }
0x12cf   :  { %v722_v44 = vpop.permute.xlu1 %721 }
0x12d0   :  { %v724_v45 = vmul.f32 %v722_v44, %v706_v37 }
0x12d2   :  { %726 = vrot.lane.b32.xlu0 %v724_v45, %s1225_s2 }
0x1344   :  { %v727_v46 = vpop.permute.xlu0 %726 }
0x1345   :  { %v729_v47 = vadd.f32 %v1115_v41, %v727_v46 }
0x1347   :  { %v1452_v48 = vpack.c.bf16 %v729_v47, %v729_v47 }
0x1349   :  { %741 = vrot.lane.b32.xlu1 %v1452_v48, %s1220_s30 }
0x13bb   :  { %v742_v49 = vpop.permute.xlu1 %741 }
0x13bc   :  { %1063 = vmatmul.mubr.msk.bf16.vlgmr.msra.gmra.mrb[16].mxu0 %vm67_vm0, %v742_v49 }
0x148f   :  { %v780_v50 = vpop.f32.mrb[16].mxu0 }
0x1490   :  { %v1064_v51 = vpop.f32.mrb[17].mxu0  ;;  %v791_v52 = vadd.f32 %v780_v50, %v1341_v10  ;;  %v786_v56 = vadd.f32 %v780_v50, %v740_v55 }
0x1491   :  { %v783_v53 = vpop.f32.mrb[18].mxu0 }
0x1492   :  { %793 = vrot.lane.b32.xlu0 %v791_v52, %s1220_s30  ;;  %v1065_v54 = vpop.f32.mrb[19].mxu0  ;;  %v787_v57 = vmul.f32 0.5, %v786_v56 }
0x1494   :  { %1116 = vtanh.f32 %v787_v57 }
0x149e   :  { %v1117_v58 = vpop.eup %1116 }
0x149f   :  { %v789_v59 = vmul.f32 0.5, %v1117_v58 }
0x14a1   :  { %v790_v60 = vadd.f32 0.5, %v789_v59 }
0x1504   :  { %v794_v61 = vpop.permute.xlu0 %793 }
0x1505   :  { %v796_v63 = vmul.f32 %v794_v61, %v790_v60 }
0x1507   :  { %798 = vrot.lane.b32.xlu1 %v796_v63, %s1220_s30 }
0x1579   :  { %v799_v1 = vpop.permute.xlu1 %798 }
0x157a   :  { %v801_v3 = vadd.f32 %v799_v1, %v740_v55 }
0x157c   :  { %1118 = vtanh.f32 %v801_v3 }
0x1586   :  { %v1119_v5 = vpop.eup %1118 }
0x1587   :  { %v803_v7 = vsub.f32 %v729_v47, %v1119_v5 }
0x1589   :  { %805 = vrot.lane.b32.xlu0 %v803_v7, %s1226_s8 }
0x15fb   :  { %v806_v8 = vpop.permute.xlu0 %805 }
0x15fc   :  { %v808_v9 = vmul.f32 %v806_v8, %v790_v60 }
0x15fe   :  { %810 = vrot.lane.b32.xlu1 %v808_v9, %s1225_s2 }
0x1670   :  { %v811_v12 = vpop.permute.xlu1 %810 }
0x1671   :  { %v813_v13 = vadd.f32 %v1119_v5, %v811_v12 }
0x1673   :  { %v814_v14 = vpack.c.bf16 %v813_v13, %v813_v13 }
0x1675   :  { %825 = vrot.lane.b32.xlu0 %v814_v14, %s1220_s30 }
0x16e7   :  { %v826_v15 = vpop.permute.xlu0 %825 }
0x16e8   :  { %1071 = vmatmul.mubr.msk.bf16.vlgmr.msra.gmra.mrb[16].mxu1 %vm67_vm0, %v826_v15 }
0x17bb   :  { %v864_v16 = vpop.f32.mrb[16].mxu1 }
0x17bc   :  { %v1072_v17 = vpop.f32.mrb[17].mxu1  ;;  %v875_v18 = vadd.f32 %v864_v16, %v1341_v10  ;;  %v870_v21 = vadd.f32 %v864_v16, %v824_v20 }
0x17bd   :  { %v867_v11 = vpop.f32.mrb[18].mxu1 }
0x17be   :  { %877 = vrot.lane.b32.xlu1 %v875_v18, %s1220_s30  ;;  %v1073_v19 = vpop.f32.mrb[19].mxu1  ;;  %v871_v22 = vmul.f32 0.5, %v870_v21 }
0x17c0   :  { %1120 = vtanh.f32 %v871_v22 }
0x17ca   :  { %v1121_v23 = vpop.eup %1120 }
0x17cb   :  { %v873_v24 = vmul.f32 0.5, %v1121_v23 }
0x17cd   :  { %v874_v25 = vadd.f32 0.5, %v873_v24 }
0x1830   :  { %v878_v27 = vpop.permute.xlu1 %877 }
0x1831   :  { %v880_v28 = vmul.f32 %v878_v27, %v874_v25 }
0x1833   :  { %882 = vrot.lane.b32.xlu0 %v880_v28, %s1220_s30 }
0x18a5   :  { %v883_v29 = vpop.permute.xlu0 %882 }
0x18a6   :  { %v885_v30 = vadd.f32 %v883_v29, %v824_v20 }
0x18a8   :  { %1122 = vtanh.f32 %v885_v30 }
0x18b2   :  { %v1123_v31 = vpop.eup %1122 }
0x18b3   :  { %v887_v10 = vsub.f32 %v813_v13, %v1123_v31 }
0x18b5   :  { %889 = vrot.lane.b32.xlu1 %v887_v10, %s1226_s8 }
0x18b9   :  { %314 = vrot.lane.b32.xlu1 %v1362_v42, %s1220_s30 }
0x18bd   :  { %482 = vrot.lane.b32.xlu1 %v1406_v38, %s1220_s30 }
0x18c1   :  { %650 = vrot.lane.b32.xlu1 %v1437_v26, %s1220_s30 }
0x18c5   :  { %818 = vrot.lane.b32.xlu1 %v814_v14, %s1220_s30 }
0x1927   :  { %v890_v32 = vpop.permute.xlu1 %889 }
0x1928   :  { %v892_v33 = vmul.f32 %v890_v32, %v874_v25 }
0x192a   :  { %894 = vrot.lane.b32.xlu0 %v892_v33, %s1225_s2 }
0x192b   :  { %v315_v34 = vpop.permute.xlu1 %314 }
0x192c   :  { %318 = vst.msk [vmem:[#allocation10] sm:$0xf] %vm317_vm3, %v315_v34 }
0x192e   :  { %398 = vrot.lane.b32.xlu0 %v1382_v6, %s1220_s30 }
0x192f   :  { %v483_v42 = vpop.permute.xlu1 %482 }
0x1930   :  { %486 = vst.msk [vmem:[#allocation10 + $0x8] sm:$0xf] %vm317_vm3, %v483_v42 }
0x1932   :  { %566 = vrot.lane.b32.xlu0 %v1422_v62, %s1220_s30 }
0x1933   :  { %v651_v38 = vpop.permute.xlu1 %650 }
0x1934   :  { %654 = vst.msk [vmem:[#allocation10 + $0x10] sm:$0xf] %vm317_vm3, %v651_v38 }
0x1936   :  { %734 = vrot.lane.b32.xlu0 %v1452_v48, %s1220_s30 }
0x1937   :  { %v819_v26 = vpop.permute.xlu1 %818 }
0x1938   :  { %822 = vst.msk [vmem:[#allocation10 + $0x18] sm:$0xf] %vm317_vm3, %v819_v26 }
0x199c   :  { %v895_v35 = vpop.permute.xlu0 %894 }
0x199d   :  { %v897_v2 = vadd.f32 %v1123_v31, %v895_v35 }
0x199f   :  { %908 = vrot.lane.b32.xlu1 %v897_v2, %s1220_s30  ;;  %v967_v6 = vpack.c.bf16 %v897_v2, %v897_v2 }
0x19a0   :  { %v399_v36 = vpop.permute.xlu0 %398 }
0x19a1   :  { %402 = vst.msk [vmem:[#allocation10 + $0x4] sm:$0xf] %vm317_vm3, %v399_v36  ;;  %902 = vrot.lane.b32.xlu0 %v967_v6, %s1220_s30 }
0x19a4   :  { %v567_v62 = vpop.permute.xlu0 %566 }
0x19a5   :  { %570 = vst.msk [vmem:[#allocation10 + $0xc] sm:$0xf] %vm317_vm3, %v567_v62 }
0x19a8   :  { %v735_v37 = vpop.permute.xlu0 %734 }
0x19a9   :  { %738 = vst.msk [vmem:[#allocation10 + $0x14] sm:$0xf] %vm317_vm3, %v735_v37 }
0x1a11   :  { %v909_v39 = vpop.permute.xlu1 %908 }
0x1a12   :  { %911 = vst.msk [vmem:[#allocation2] sm:$0xff] %vm67_vm0, %v909_v39 }
0x1a13   :  { %v903_v40 = vpop.permute.xlu0 %902 }
0x1a14   :  { %906 = vst.msk [vmem:[#allocation10 + $0x1c] sm:$0xf] %vm317_vm3, %v903_v40 }
0x1a15   :  { %1201 = shalt.err (!%p1198_p0)
}
0x1a16   :  { %s1202_s14 = scalar_lea.hbm %s1513_s5, 512 }
0x1a17   :  { %p1203_p1 = scmp.ne.s32.totalorder %s1513_s5, %s1202_s14  ;;  %p1206_p2 = scmp.lt.u32.totalorder %s1202_s14, %s1513_s5 }
0x1a19   :  { %p1208_p3 = pnand %p1206_p2, %p1203_p1 }
0x1a1b   :  { %1211 = shalt.err (!%p1208_p3)
}
0x1a1c   :  { %923 = dma.vmem_to_hbm [thread:$0]  %s918_s10, 512, %s1513_s5, [#allocation6], %s1220_s30, %s1220_s30, %s1221_s6  }
0x1a1d   :  { %1216 = dma.done.wait [#allocation6], 512  }
0x1a1e   :  { %1217 = vsyncadd [#allocation6], 4294966784 }
0x1a1f   :  { %927 = vsyncpa [#allocation5], 1 }
0x1a20   :  { %928 = vsyncpa [#allocation8], 1 }
0x1a21   :  { %929 = vsyncpa [#allocation6], 1 }

</bundles_post_ra>
